<compile_context>
chip_gen: v5e
topology: v5e:2x2
jax: 0.10.0
libtpu: 0.0.40
codegen_flags: <defaults>
</compile_context>

<pallas_src>
import jax
import jax.numpy as jnp
from jax.experimental import pallas as pl
from jax.experimental.pallas import tpu as pltpu


def _round_up(n, m):
    return ((n + m - 1) // m) * m


def mlp_kernel(x_ref, w1_ref, b1_ref, w2_ref, b2_ref, w3_ref, b3_ref, o_ref):
    # Input tile arrives as f32; cast to bf16 on the VPU (weights are already bf16).
    x = x_ref[...].astype(jnp.bfloat16)
    # Layer 1: Linear(784 -> 512) + ReLU   (bf16 x bf16 -> f32 accumulate)
    h1 = jnp.dot(x, w1_ref[...], preferred_element_type=jnp.float32) + b1_ref[...]
    h1 = jnp.maximum(h1, 0.0)
    # Layer 2: Linear(512 -> 512) + ReLU
    h2 = jnp.dot(h1.astype(jnp.bfloat16), w2_ref[...],
                 preferred_element_type=jnp.float32) + b2_ref[...]
    h2 = jnp.maximum(h2, 0.0)
    # Layer 3: Linear(512 -> 128-padded) logits; columns 10..127 are zero weights/bias.
    o_ref[...] = jnp.dot(h2.astype(jnp.bfloat16), w3_ref[...],
                         preferred_element_type=jnp.float32) + b3_ref[...]


def prepare_params(params):
    """One-time (hoisted) preprocessing: bf16 weights, lane-dense 128-wide padded W3/b3."""
    w1, b1, w2, b2, w3, b3 = params
    d_out = w3.shape[1]
    d_out_pad = 128  # lane-dense output width
    w3p = jnp.zeros((w3.shape[0], d_out_pad), jnp.bfloat16).at[:, :d_out].set(
        w3.astype(jnp.bfloat16))
    b3p = jnp.zeros((1, d_out_pad), jnp.float32).at[:, :d_out].set(
        b3.reshape(1, -1).astype(jnp.float32))
    return (
        w1.astype(jnp.bfloat16), b1.reshape(1, -1).astype(jnp.float32),
        w2.astype(jnp.bfloat16), b2.reshape(1, -1).astype(jnp.float32),
        w3p, b3p, d_out,
    )


def neural_network_forward(x_nchw, prepared, *, batch_tile=512):
    """x_nchw: (B, 1, 28, 28) float32. Returns logits (B, 10) float32."""
    w1b, b1, w2b, b2, w3p, b3p, d_out = prepared
    B = x_nchw.shape[0]
    # nn.Flatten(start_dim=1): (B, 1, 28, 28) -> (B, 784); stays f32, no wrapper cast/pad.
    x = x_nchw.reshape(B, -1)

    D_in, H1 = w1b.shape
    H2 = w2b.shape[1]
    D_out_pad = w3p.shape[1]

    # Batch tile: multiple of 16 (bf16 sublane packing); multiple of 128 at large B.
    bt = min(batch_tile, _round_up(B, 16))
    # v7x has 2 TensorCores: make sure the "parallel" batch axis has >= 2 steps
    # whenever the batch is big enough to split.
    if pl.cdiv(B, bt) < 2 and B > 16:
        bt = _round_up(pl.cdiv(B, 2), 16)
    grid = (pl.cdiv(B, bt),)  # partial last block is masked; padded rows never read back

    resident = pl.Buffered(1)  # constant-index operands: single resident VMEM buffer
    in_specs = [
        pl.BlockSpec((bt, D_in), lambda i: (i, 0)),                               # x tile
        pl.BlockSpec((D_in, H1), lambda i: (0, 0), pipeline_mode=resident),       # w1
        pl.BlockSpec((1, H1), lambda i: (0, 0), pipeline_mode=resident),          # b1
        pl.BlockSpec((H1, H2), lambda i: (0, 0), pipeline_mode=resident),         # w2
        pl.BlockSpec((1, H2), lambda i: (0, 0), pipeline_mode=resident),          # b2
        pl.BlockSpec((H2, D_out_pad), lambda i: (0, 0), pipeline_mode=resident),  # w3 (padded)
        pl.BlockSpec((1, D_out_pad), lambda i: (0, 0), pipeline_mode=resident),   # b3 (padded)
    ]
    out_specs = pl.BlockSpec((bt, D_out_pad), lambda i: (i, 0))

    out = pl.pallas_call(
        mlp_kernel,
        out_shape=jax.ShapeDtypeStruct((B, D_out_pad), jnp.float32),
        grid=grid,
        in_specs=in_specs,
        out_specs=out_specs,
        compiler_params=pltpu.CompilerParams(
            dimension_semantics=("parallel",),      # batch tiles shard across TCs (v7x)
            vmem_limit_bytes=32 * 1024 * 1024,      # fits v5e/v6e/v7x; usage <~14 MiB @ bt=1024
        ),
    )(x, w1b, b1, w2b, b2, w3p, b3p)

    return out[:, :d_out]


def init_params(key):
    """Deterministic parameter init (Kaiming-uniform-ish, like torch defaults)."""
    def linear(key, fan_in, fan_out):
        kw, kb = jax.random.split(key)
        bound = 1.0 / jnp.sqrt(fan_in)
        # Stored as (in, out) so the kernel does x @ W + b.
        w = jax.random.uniform(kw, (fan_in, fan_out), jnp.float32, -bound, bound)
        b = jax.random.uniform(kb, (1, fan_out), jnp.float32, -bound, bound)
        return w, b

    k1, k2, k3 = jax.random.split(key, 3)
    w1, b1 = linear(k1, 28 * 28, 512)
    w2, b2 = linear(k2, 512, 512)
    w3, b3 = linear(k3, 512, 10)
    return (w1, b1, w2, b2, w3, b3)


def reference_forward(x_nchw, params):
    """Pure-JAX reference using the same bf16-weight / f32-accumulate numerics."""
    w1, b1, w2, b2, w3, b3 = params
    x = x_nchw.reshape(x_nchw.shape[0], -1).astype(jnp.bfloat16)
    h1 = jnp.dot(x, w1.astype(jnp.bfloat16), preferred_element_type=jnp.float32) + b1
    h1 = jnp.maximum(h1, 0.0)
    h2 = jnp.dot(h1.astype(jnp.bfloat16), w2.astype(jnp.bfloat16),
                 preferred_element_type=jnp.float32) + b2
    h2 = jnp.maximum(h2, 0.0)
    return jnp.dot(h2.astype(jnp.bfloat16), w3.astype(jnp.bfloat16),
                   preferred_element_type=jnp.float32) + b3


if __name__ == "__main__":
    key = jax.random.PRNGKey(0)
    k_params, k_x, k_x2 = jax.random.split(key, 3)

    params = init_params(k_params)
    prepared = prepare_params(params)        # one-time weight cast/pad (hoisted)

    # Small batch of MNIST-shaped inputs, NCHW like the PyTorch module expects.
    x = jax.random.uniform(k_x, (2, 1, 28, 28), jnp.float32)
    logits = jax.block_until_ready(neural_network_forward(x, prepared))
    ref = reference_forward(x, params)
    assert logits.shape == (2, 10)
    assert jnp.allclose(logits, ref, atol=2e-2, rtol=2e-2)

    # Second check: non-multiple batch exercises the 2-step parallel grid + masked
    # partial last block.
    x2 = jax.random.uniform(k_x2, (100, 1, 28, 28), jnp.float32)
    logits2 = jax.block_until_ready(neural_network_forward(x2, prepared))
    ref2 = reference_forward(x2, params)
    assert logits2.shape == (100, 10)
    assert jnp.allclose(logits2, ref2, atol=2e-2, rtol=2e-2)

    print("KERNEL_OK")
</pallas_src>

<mosaic_0001>
module attributes {stable_mosaic.version = 11 : i64} {
  func.func @mlp_kernel(%arg0: i32, %arg1: memref<16x784xf32, #tpu.memory_space<vmem>>, %arg2: memref<784x512xbf16, #tpu.memory_space<vmem>>, %arg3: memref<1x512xf32, #tpu.memory_space<vmem>>, %arg4: memref<512x512xbf16, #tpu.memory_space<vmem>>, %arg5: memref<1x512xf32, #tpu.memory_space<vmem>>, %arg6: memref<512x128xbf16, #tpu.memory_space<vmem>>, %arg7: memref<1x128xf32, #tpu.memory_space<vmem>>, %arg8: memref<16x128xf32, #tpu.memory_space<vmem>>) attributes {dimension_semantics = [#tpu.dimension_semantics<parallel>], iteration_bounds = array<i64: 1>, scalar_prefetch = 0 : i64, scratch_operands = 0 : i64, tpu.core_type = #tpu.core_type<tc>, window_params = [{transform_indices = @transform_0, window_bounds = array<i64: 16, 784>}, {pipeline_mode = #tpu.pipeline_mode<synchronous>, transform_indices = @transform_1, window_bounds = array<i64: 784, 512>}, {pipeline_mode = #tpu.pipeline_mode<synchronous>, transform_indices = @transform_2, window_bounds = array<i64: 1, 512>}, {pipeline_mode = #tpu.pipeline_mode<synchronous>, transform_indices = @transform_3, window_bounds = array<i64: 512, 512>}, {pipeline_mode = #tpu.pipeline_mode<synchronous>, transform_indices = @transform_4, window_bounds = array<i64: 1, 512>}, {pipeline_mode = #tpu.pipeline_mode<synchronous>, transform_indices = @transform_5, window_bounds = array<i64: 512, 128>}, {pipeline_mode = #tpu.pipeline_mode<synchronous>, transform_indices = @transform_6, window_bounds = array<i64: 1, 128>}, {transform_indices = @transform_7, window_bounds = array<i64: 16, 128>}]} {
    %c0 = arith.constant 0 : index
    %c0_0 = arith.constant 0 : index
    %0 = vector.load %arg1[%c0, %c0_0] : memref<16x784xf32, #tpu.memory_space<vmem>>, vector<16x784xf32>
    %1 = arith.truncf %0 : vector<16x784xf32> to vector<16x784xbf16>
    %c0_1 = arith.constant 0 : index
    %c0_2 = arith.constant 0 : index
    %2 = vector.load %arg2[%c0_1, %c0_2] : memref<784x512xbf16, #tpu.memory_space<vmem>>, vector<784x512xbf16>
    %cst = arith.constant dense<0.000000e+00> : vector<16x512xf32>
    %3 = tpu.matmul %1, %2, %cst {dimension_numbers = #tpu.dot_dimension_numbers<[1], [0], [0], [1], [0, 0, 1, 1], [], []>} : vector<16x784xbf16>, vector<784x512xbf16>, vector<16x512xf32> -> vector<16x512xf32>
    %c0_3 = arith.constant 0 : index
    %c0_4 = arith.constant 0 : index
    %4 = vector.load %arg3[%c0_3, %c0_4] : memref<1x512xf32, #tpu.memory_space<vmem>>, vector<1x512xf32>
    %5 = vector.broadcast %4 : vector<1x512xf32> to vector<16x512xf32>
    %6 = arith.addf %3, %5 : vector<16x512xf32>
    %cst_5 = arith.constant 0.000000e+00 : f32
    %7 = vector.broadcast %cst_5 : f32 to vector<16x512xf32>
    %8 = arith.maximumf %6, %7 : vector<16x512xf32>
    %9 = arith.truncf %8 : vector<16x512xf32> to vector<16x512xbf16>
    %c0_6 = arith.constant 0 : index
    %c0_7 = arith.constant 0 : index
    %10 = vector.load %arg4[%c0_6, %c0_7] : memref<512x512xbf16, #tpu.memory_space<vmem>>, vector<512x512xbf16>
    %cst_8 = arith.constant dense<0.000000e+00> : vector<16x512xf32>
    %11 = tpu.matmul %9, %10, %cst_8 {dimension_numbers = #tpu.dot_dimension_numbers<[1], [0], [0], [1], [0, 0, 1, 1], [], []>} : vector<16x512xbf16>, vector<512x512xbf16>, vector<16x512xf32> -> vector<16x512xf32>
    %c0_9 = arith.constant 0 : index
    %c0_10 = arith.constant 0 : index
    %12 = vector.load %arg5[%c0_9, %c0_10] : memref<1x512xf32, #tpu.memory_space<vmem>>, vector<1x512xf32>
    %13 = vector.broadcast %12 : vector<1x512xf32> to vector<16x512xf32>
    %14 = arith.addf %11, %13 : vector<16x512xf32>
    %cst_11 = arith.constant 0.000000e+00 : f32
    %15 = vector.broadcast %cst_11 : f32 to vector<16x512xf32>
    %16 = arith.maximumf %14, %15 : vector<16x512xf32>
    %17 = arith.truncf %16 : vector<16x512xf32> to vector<16x512xbf16>
    %c0_12 = arith.constant 0 : index
    %c0_13 = arith.constant 0 : index
    %18 = vector.load %arg6[%c0_12, %c0_13] : memref<512x128xbf16, #tpu.memory_space<vmem>>, vector<512x128xbf16>
    %cst_14 = arith.constant dense<0.000000e+00> : vector<16x128xf32>
    %19 = tpu.matmul %17, %18, %cst_14 {dimension_numbers = #tpu.dot_dimension_numbers<[1], [0], [0], [1], [0, 0, 1, 1], [], []>} : vector<16x512xbf16>, vector<512x128xbf16>, vector<16x128xf32> -> vector<16x128xf32>
    %c0_15 = arith.constant 0 : index
    %c0_16 = arith.constant 0 : index
    %20 = vector.load %arg7[%c0_15, %c0_16] : memref<1x128xf32, #tpu.memory_space<vmem>>, vector<1x128xf32>
    %21 = vector.broadcast %20 : vector<1x128xf32> to vector<16x128xf32>
    %22 = arith.addf %19, %21 : vector<16x128xf32>
    %c0_17 = arith.constant 0 : index
    %c0_18 = arith.constant 0 : index
    %23 = vector.load %arg8[%c0_17, %c0_18] : memref<16x128xf32, #tpu.memory_space<vmem>>, vector<16x128xf32>
    tpu.vector_store %arg8[%c0_17, %c0_18], %22 {strides = array<i32>} : memref<16x128xf32, #tpu.memory_space<vmem>>, vector<16x128xf32>,
    return
  }
  func.func @transform_0(%arg0: i32) -> (i32, i32) {
    %c0_i32 = arith.constant 0 : i32
    %c0_i32_0 = arith.constant 0 : i32
    return %arg0, %c0_i32 : i32, i32
  }
  func.func @transform_1(%arg0: i32) -> (i32, i32) {
    %c0_i32 = arith.constant 0 : i32
    %c0_i32_0 = arith.constant 0 : i32
    %c0_i32_1 = arith.constant 0 : i32
    return %c0_i32, %c0_i32_0 : i32, i32
  }
  func.func @transform_2(%arg0: i32) -> (i32, i32) {
    %c0_i32 = arith.constant 0 : i32
    %c0_i32_0 = arith.constant 0 : i32
    %c0_i32_1 = arith.constant 0 : i32
    return %c0_i32, %c0_i32_0 : i32, i32
  }
  func.func @transform_3(%arg0: i32) -> (i32, i32) {
    %c0_i32 = arith.constant 0 : i32
    %c0_i32_0 = arith.constant 0 : i32
    %c0_i32_1 = arith.constant 0 : i32
    return %c0_i32, %c0_i32_0 : i32, i32
  }
  func.func @transform_4(%arg0: i32) -> (i32, i32) {
    %c0_i32 = arith.constant 0 : i32
    %c0_i32_0 = arith.constant 0 : i32
    %c0_i32_1 = arith.constant 0 : i32
    return %c0_i32, %c0_i32_0 : i32, i32
  }
  func.func @transform_5(%arg0: i32) -> (i32, i32) {
    %c0_i32 = arith.constant 0 : i32
    %c0_i32_0 = arith.constant 0 : i32
    %c0_i32_1 = arith.constant 0 : i32
    return %c0_i32, %c0_i32_0 : i32, i32
  }
  func.func @transform_6(%arg0: i32) -> (i32, i32) {
    %c0_i32 = arith.constant 0 : i32
    %c0_i32_0 = arith.constant 0 : i32
    %c0_i32_1 = arith.constant 0 : i32
    return %c0_i32, %c0_i32_0 : i32, i32
  }
  func.func @transform_7(%arg0: i32) -> (i32, i32) {
    %c0_i32 = arith.constant 0 : i32
    %c0_i32_0 = arith.constant 0 : i32
    return %arg0, %c0_i32 : i32, i32
  }
}

</mosaic_0001>

<bundles_post_ra>
// kernel: tpu_custom_call.1
= control target key start
LH: loop header
LB: loop body
LE: loop exit
PB: predicated region body
PF: predicated region fallthrough
CT: control target
= control target key end

     0   :  { %12 = vsyncpa [#allocation3], 0  ;;  %s5307_s0 = inlined_call_operand.hbm [shape: f32[2,784], index: 0, kind: input, shape index: {}]   ;;  %s5308_s1 = inlined_call_operand.hbm [shape: bf16[784,512], index: 1, kind: input, shape index: {}]   ;;  %s5309_s2 = inlined_call_operand.hbm [shape: f32[1,512], index: 2, kind: input, shape index: {}]   ;;  %s5310_s3 = inlined_call_operand.hbm [shape: bf16[512,512], index: 3, kind: input, shape index: {}]   ;;  %s5311_s4 = inlined_call_operand.hbm [shape: f32[1,512], index: 4, kind: input, shape index: {}]   ;;  %s5312_s5 = inlined_call_operand.hbm [shape: bf16[512,128], index: 5, kind: input, shape index: {}]   ;;  %s5313_s6 = inlined_call_operand.vmem [shape: f32[1,128], index: 6, kind: input, shape index: {}]   ;;  %s5314_s7 = inlined_call_operand.hbm [shape: f32[2,128], index: 7, kind: output, shape index: {}]  }
   0x1   :  { %13 = vsyncpa [#allocation6], 0 }
   0x2   :  { %14 = vsyncpa [#allocation9], 0 }
   0x3   :  { %15 = vsyncpa [#allocation12], 0 }
   0x4   :  { %16 = vsyncpa [#allocation4], 0  ;;  %s34_s26 = sshll.u32 %s5308_s1, 4  ;;  %s35_s26 = int_to_ptr.hbm [resolvable:$true] %s34_s26 }
   0x5   :  { %20 = vsyncadd [#allocation3], 1568  ;;  %s5134_s27 = smov [#allocation5]   ;;  %s58_s8 = sshll.u32 %s5310_s3, 4  ;;  %s59_s8 = int_to_ptr.hbm [resolvable:$true] %s58_s8 }
   0x6   :  { %s36_s28 = sshll.u32 %s5134_s27, 4  ;;  %s5135_s9 = smov 256   ;;  %s37_s28 = int_to_ptr.vmem [resolvable:$true] %s36_s28 }
   0x7   :  { %s5136_s10 = smov 16   ;;  %s5137_s11 = smov [#allocation8]  }
   0x8   :  { %42 = dma.hbm_to_vmem [thread:$0]  %s35_s26, 25088, %s37_s28, [#allocation6], %s5135_s9, %s5135_s9, %s5136_s10  }
   0x9   :  { %s60_s12 = sshll.u32 %s5137_s11, 4  ;;  %s21_s15 = sshll.u32 %s5307_s0, 4  ;;  %s61_s12 = int_to_ptr.vmem [resolvable:$true] %s60_s12  ;;  %s22_s15 = int_to_ptr.hbm [resolvable:$true] %s21_s15 }
   0xa   :  { %66 = dma.hbm_to_vmem [thread:$0]  %s59_s8, 16384, %s61_s12, [#allocation9], %s5135_s9, %s5135_s9, %s5136_s10  }
   0xb   :  { %s5138_s1 = smov [#allocation2]   ;;  %s48_s3 = sshll.u32 %s5309_s2, 4  ;;  %s49_s3 = int_to_ptr.hbm [resolvable:$true] %s48_s3 }
   0xc   :  { %s23_s16 = sshll.u32 %s5138_s1, 4  ;;  %s5139_s19 = smov 224   ;;  %s24_s16 = int_to_ptr.vmem [resolvable:$true] %s23_s16 }
   0xd   :  { %s5140_s20 = smov 14   ;;  %s5141_s21 = smov [#allocation7]  }
   0xe   :  { %29 = dma.hbm_to_vmem [thread:$0]  %s22_s15, 224, %s24_s16, [#allocation3], %s5139_s19, %s5139_s19, %s5140_s20  }
   0xf   :  { %s50_s22 = sshll.u32 %s5141_s21, 4  ;;  %s72_s0 = sshll.u32 %s5311_s4, 4  ;;  %s51_s22 = int_to_ptr.vmem [resolvable:$true] %s50_s22  ;;  %s73_s0 = int_to_ptr.hbm [resolvable:$true] %s72_s0 }
  0x10   :  { %53 = dma.hbm_to_vmem [thread:$0]  %s49_s3, 64, %s51_s22, [#allocation6]  }
  0x11   :  { %s82_s27 = sshll.u32 %s5312_s5, 4  ;;  %s5142_s28 = smov [#allocation10]   ;;  %s83_s27 = int_to_ptr.hbm [resolvable:$true] %s82_s27 }
  0x12   :  { %s74_s29 = sshll.u32 %s5142_s28, 4  ;;  %s5143_s2 = smov [#allocation11]   ;;  %s75_s29 = int_to_ptr.vmem [resolvable:$true] %s74_s29 }
  0x13   :  { %77 = dma.hbm_to_vmem [thread:$0]  %s73_s0, 64, %s75_s29, [#allocation9]  }
  0x14   :  { %s84_s30 = sshll.u32 %s5143_s2, 4  ;;  %s5144_s8 = smov 64   ;;  %s85_s30 = int_to_ptr.vmem [resolvable:$true] %s84_s30 }
  0x15   :  { %s5145_s9 = smov 4  }
  0x16   :  { %90 = dma.hbm_to_vmem [thread:$0]  %s83_s27, 4096, %s85_s30, [#allocation12], %s5144_s8, %s5144_s8, %s5145_s9  }
  0x17   :  { %5124 = dma.done.wait [#allocation3], 1792  }
  0x18   :  { %5125 = vsyncadd [#allocation3], 4294965504 }
  0x19   :  { %5126 = dma.done.wait [#allocation6], 25152  }
  0x1a   :  { %5127 = vsyncadd [#allocation6], 4294942144 }
  0x1b   :  { %5128 = dma.done.wait [#allocation9], 16448  }
  0x1c   :  { %5129 = vsyncadd [#allocation9], 4294950848 }
  0x1d   :  { %5130 = dma.done.wait [#allocation12], 4096  }
  0x1e   :  { %5131 = vsyncadd [#allocation12], 4294963200  ;;  %v3270_v0 = vld [vmem:[#allocation5 + $0xe0] sm:$0xf]  ;;  %v4614_v1 = vld [vmem:[#allocation5 + $0xec] sm:$0xf0] }
  0x1f   :  { %v3398_v2 = vld [vmem:[#allocation5 + $0x1e0] sm:$0xf]  ;;  %v3271_v3 = vor.u32 %v4614_v1, %v3270_v0  ;;  %v4646_v4 = vld [vmem:[#allocation5 + $0x1ec] sm:$0xf0]  ;;  %vm1394_vm0 = vcmask 130048  }
  0x20   :  { %v3526_v5 = vld [vmem:[#allocation5 + $0x2e0] sm:$0xf]  ;;  %v4678_v6 = vld [vmem:[#allocation5 + $0x2ec] sm:$0xf0]  ;;  %v3399_v7 = vor.u32 %v4646_v4, %v3398_v2 }
  0x21   :  { %v3527_v8 = vor.u32 %v4678_v6, %v3526_v5  ;;  %v3654_v9 = vld [vmem:[#allocation5 + $0x3e0] sm:$0xf]  ;;  %v4710_v10 = vld [vmem:[#allocation5 + $0x3ec] sm:$0xf0]  ;;  %1398 = vmatpush.bf16.msra.mxu0 %v3271_v3 }
  0x22   :  { %v3254_v11 = vld [vmem:[#allocation5 + $0xc0] sm:$0xf]  ;;  %v3655_v12 = vor.u32 %v4710_v10, %v3654_v9  ;;  %v4610_v13 = vld [vmem:[#allocation5 + $0xcc] sm:$0xf0]  ;;  %1412 = vmatpush.bf16.msra.mxu1 %v3399_v7 }
  0x23   :  { %v3382_v14 = vld [vmem:[#allocation5 + $0x1c0] sm:$0xf]  ;;  %v4642_v15 = vld [vmem:[#allocation5 + $0x1cc] sm:$0xf0]  ;;  %1426 = vmatpush.bf16.msra.mxu2 %v3527_v8  ;;  %v3255_v16 = vor.u32 %v4610_v13, %v3254_v11 }
  0x24   :  { %v3383_v17 = vor.u32 %v4642_v15, %v3382_v14  ;;  %v3510_v18 = vld [vmem:[#allocation5 + $0x2c0] sm:$0xf]  ;;  %v4674_v19 = vld [vmem:[#allocation5 + $0x2cc] sm:$0xf0]  ;;  %1440 = vmatpush.bf16.msra.mxu3 %v3655_v12 }
  0x25   :  { %v3638_v20 = vld [vmem:[#allocation5 + $0x3c0] sm:$0xf]  ;;  %v3511_v21 = vor.u32 %v4674_v19, %v3510_v18  ;;  %v4706_v22 = vld [vmem:[#allocation5 + $0x3cc] sm:$0xf0]  ;;  %1399 = vmatpush.bf16.msra.mxu0 %v3255_v16 }
  0x26   :  { %v3238_v23 = vld [vmem:[#allocation5 + $0xa0] sm:$0xf]  ;;  %v4606_v24 = vld [vmem:[#allocation5 + $0xac] sm:$0xf0]  ;;  %v3639_v25 = vor.u32 %v4706_v22, %v3638_v20  ;;  %1413 = vmatpush.bf16.msra.mxu1 %v3383_v17 }
  0x27   :  { %v3366_v26 = vld [vmem:[#allocation5 + $0x1a0] sm:$0xf]  ;;  %v4638_v27 = vld [vmem:[#allocation5 + $0x1ac] sm:$0xf0]  ;;  %v3239_v29 = vor.u32 %v4606_v24, %v3238_v23  ;;  %1427 = vmatpush.bf16.msra.mxu2 %v3511_v21 }
  0x28   :  { %v3494_v28 = vld [vmem:[#allocation5 + $0x2a0] sm:$0xf]  ;;  %v4670_v30 = vld [vmem:[#allocation5 + $0x2ac] sm:$0xf0]  ;;  %v3367_v33 = vor.u32 %v4638_v27, %v3366_v26  ;;  %1441 = vmatpush.bf16.msra.mxu3 %v3639_v25 }
  0x29   :  { %v3622_v31 = vld [vmem:[#allocation5 + $0x3a0] sm:$0xf]  ;;  %v4702_v32 = vld [vmem:[#allocation5 + $0x3ac] sm:$0xf0]  ;;  %v3495_v34 = vor.u32 %v4670_v30, %v3494_v28  ;;  %1400 = vmatpush.bf16.msra.mxu0 %v3239_v29 }
  0x2a   :  { %v3222_v35 = vld [vmem:[#allocation5 + $0x80] sm:$0xf]  ;;  %v4602_v36 = vld [vmem:[#allocation5 + $0x8c] sm:$0xf0]  ;;  %v3623_v38 = vor.u32 %v4702_v32, %v3622_v31  ;;  %1414 = vmatpush.bf16.msra.mxu1 %v3367_v33 }
  0x2b   :  { %v3350_v37 = vld [vmem:[#allocation5 + $0x180] sm:$0xf]  ;;  %v4634_v39 = vld [vmem:[#allocation5 + $0x18c] sm:$0xf0]  ;;  %v3223_v44 = vor.u32 %v4602_v36, %v3222_v35  ;;  %1428 = vmatpush.bf16.msra.mxu2 %v3495_v34 }
  0x2c   :  { %v3478_v40 = vld [vmem:[#allocation5 + $0x280] sm:$0xf]  ;;  %v4666_v41 = vld [vmem:[#allocation5 + $0x28c] sm:$0xf0]  ;;  %v3351_v45 = vor.u32 %v4634_v39, %v3350_v37  ;;  %1442 = vmatpush.bf16.msra.mxu3 %v3623_v38  ;;  %v4612_v37 = vld [vmem:[#allocation5 + $0xe4] sm:$0xf] }
  0x2d   :  { %v3606_v42 = vld [vmem:[#allocation5 + $0x380] sm:$0xf]  ;;  %v4698_v43 = vld [vmem:[#allocation5 + $0x38c] sm:$0xf0]  ;;  %v3479_v46 = vor.u32 %v4666_v41, %v3478_v40  ;;  %1401 = vmatpush.bf16.msra.mxu0 %v3223_v44  ;;  %v3272_v38 = vld [vmem:[#allocation5 + $0xf0] sm:$0xf0] }
  0x2e   :  { %v3206_v47 = vld [vmem:[#allocation5 + $0x60] sm:$0xf]  ;;  %v4598_v48 = vld [vmem:[#allocation5 + $0x6c] sm:$0xf0]  ;;  %v3607_v50 = vor.u32 %v4698_v43, %v3606_v42  ;;  %1415 = vmatpush.bf16.msra.mxu1 %v3351_v45 }
  0x2f   :  { %v3334_v49 = vld [vmem:[#allocation5 + $0x160] sm:$0xf]  ;;  %v4630_v51 = vld [vmem:[#allocation5 + $0x16c] sm:$0xf0]  ;;  %v3207_v56 = vor.u32 %v4598_v48, %v3206_v47  ;;  %1429 = vmatpush.bf16.msra.mxu2 %v3479_v46  ;;  %v3275_v46 = vor.u32 %v4612_v37, %v3272_v38 }
  0x30   :  { %v3462_v52 = vld [vmem:[#allocation5 + $0x260] sm:$0xf]  ;;  %v4662_v53 = vld [vmem:[#allocation5 + $0x26c] sm:$0xf0]  ;;  %v3335_v57 = vor.u32 %v4630_v51, %v3334_v49  ;;  %1443 = vmatpush.bf16.msra.mxu3 %v3607_v50  ;;  %v126_v50 = vld [vmem:[#allocation2 + $0x38] sm:$0xff] }
  0x31   :  { %v3590_v54 = vld [vmem:[#allocation5 + $0x360] sm:$0xf]  ;;  %v4694_v55 = vld [vmem:[#allocation5 + $0x36c] sm:$0xf0]  ;;  %v3463_v58 = vor.u32 %v4662_v53, %v3462_v52  ;;  %1402 = vmatpush.bf16.msra.mxu0 %v3207_v56  ;;  %v4608_v53 = vld [vmem:[#allocation5 + $0xc4] sm:$0xf] }
  0x32   :  { %v3190_v59 = vld [vmem:[#allocation5 + $0x40] sm:$0xf]  ;;  %v4594_v60 = vld [vmem:[#allocation5 + $0x4c] sm:$0xf0]  ;;  %v3591_v62 = vor.u32 %v4694_v55, %v3590_v54  ;;  %1416 = vmatpush.bf16.msra.mxu1 %v3335_v57  ;;  %v3256_v54 = vld [vmem:[#allocation5 + $0xd0] sm:$0xf0] }
  0x33   :  { %v3318_v61 = vld [vmem:[#allocation5 + $0x140] sm:$0xf]  ;;  %v4626_v63 = vld [vmem:[#allocation5 + $0x14c] sm:$0xf0]  ;;  %v3191_v4 = vor.u32 %v4594_v60, %v3190_v59  ;;  %1430 = vmatpush.bf16.msra.mxu2 %v3463_v58  ;;  %v128_v55 = vld [vmem:[#allocation2 + $0x46] sm:$0xff] }
  0x34   :  { %v3446_v0 = vld [vmem:[#allocation5 + $0x240] sm:$0xf]  ;;  %v4658_v1 = vld [vmem:[#allocation5 + $0x24c] sm:$0xf0]  ;;  %v3319_v6 = vor.u32 %v4626_v63, %v3318_v61  ;;  %1444 = vmatpush.bf16.msra.mxu3 %v3591_v62  ;;  %v130_v58 = vld [vmem:[#allocation2 + $0x54] sm:$0xff] }
  0x35   :  { %v3574_v2 = vld [vmem:[#allocation5 + $0x340] sm:$0xf]  ;;  %v4690_v3 = vld [vmem:[#allocation5 + $0x34c] sm:$0xf0]  ;;  %v3447_v7 = vor.u32 %v4658_v1, %v3446_v0  ;;  %1403 = vmatpush.bf16.msra.mxu0 %v3191_v4  ;;  %v4604_v62 = vld [vmem:[#allocation5 + $0xa4] sm:$0xf] }
  0x36   :  { %v3174_v5 = vld [vmem:[#allocation5 + $0x20] sm:$0xf]  ;;  %v4590_v8 = vld [vmem:[#allocation5 + $0x2c] sm:$0xf0]  ;;  %v3575_v11 = vor.u32 %v4690_v3, %v3574_v2  ;;  %1417 = vmatpush.bf16.msra.mxu1 %v3319_v6  ;;  %v3240_v63 = vld [vmem:[#allocation5 + $0xb0] sm:$0xf0]  ;;  %v3259_v3 = vor.u32 %v4608_v53, %v3256_v54 }
  0x37   :  { %v3302_v9 = vld [vmem:[#allocation5 + $0x120] sm:$0xf]  ;;  %v4622_v10 = vld [vmem:[#allocation5 + $0x12c] sm:$0xf0]  ;;  %v3175_v18 = vor.u32 %v4590_v8, %v3174_v5  ;;  %1431 = vmatpush.bf16.msra.mxu2 %v3447_v7 }
  0x38   :  { %v3430_v12 = vld [vmem:[#allocation5 + $0x220] sm:$0xf]  ;;  %v4654_v13 = vld [vmem:[#allocation5 + $0x22c] sm:$0xf0]  ;;  %v3303_v25 = vor.u32 %v4622_v10, %v3302_v9  ;;  %1445 = vmatpush.bf16.msra.mxu3 %v3575_v11  ;;  %v3243_v11 = vor.u32 %v4604_v62, %v3240_v63  ;;  %v3176_v62 = vld [vmem:[#allocation5 + $0x30] sm:$0xf0] }
  0x39   :  { %v3558_v14 = vld [vmem:[#allocation5 + $0x320] sm:$0xf]  ;;  %v4686_v15 = vld [vmem:[#allocation5 + $0x32c] sm:$0xf0]  ;;  %v3431_v26 = vor.u32 %v4654_v13, %v3430_v12  ;;  %1404 = vmatpush.bf16.msra.mxu0 %v3175_v18 }
  0x3a   :  { %v3158_v16 = vld [vmem:[#allocation5] sm:$0xf]  ;;  %v4586_v17 = vld [vmem:[#allocation5 + $0xc] sm:$0xf0]  ;;  %v3559_v31 = vor.u32 %v4686_v15, %v3558_v14  ;;  %1418 = vmatpush.bf16.msra.mxu1 %v3303_v25  ;;  %v4600_v14 = vld [vmem:[#allocation5 + $0x84] sm:$0xf] }
  0x3b   :  { %v3286_v19 = vld [vmem:[#allocation5 + $0x100] sm:$0xf]  ;;  %v4618_v20 = vld [vmem:[#allocation5 + $0x10c] sm:$0xf0]  ;;  %v3159_v36 = vor.u32 %v4586_v17, %v3158_v16  ;;  %1432 = vmatpush.bf16.msra.mxu2 %v3431_v26  ;;  %v3224_v15 = vld [vmem:[#allocation5 + $0x90] sm:$0xf0] }
  0x3c   :  { %v3414_v21 = vld [vmem:[#allocation5 + $0x200] sm:$0xf]  ;;  %v4650_v22 = vld [vmem:[#allocation5 + $0x20c] sm:$0xf0]  ;;  %v3287_v39 = vor.u32 %v4618_v20, %v3286_v19  ;;  %1446 = vmatpush.bf16.msra.mxu3 %v3559_v31  ;;  %v3227_v18 = vor.u32 %v4600_v14, %v3224_v15  ;;  %v4644_v19 = vld [vmem:[#allocation5 + $0x1e4] sm:$0xf] }
  0x3d   :  { %v118_v23 = vld [vmem:[#allocation2] sm:$0xff]  ;;  %v120_v24 = vld [vmem:[#allocation2 + $0xe] sm:$0xff]  ;;  %v3415_v40 = vor.u32 %v4650_v22, %v3414_v21  ;;  %1405 = vmatpush.bf16.msra.mxu0 %v3159_v36 }
  0x3e   :  { %v3542_v27 = vld [vmem:[#allocation5 + $0x300] sm:$0xf]  ;;  %v4682_v28 = vld [vmem:[#allocation5 + $0x30c] sm:$0xf0]  ;;  %150 = vst [vmem:[#allocation1] ss:$4 sm:$0xff] %v118_v23  ;;  %1419 = vmatpush.bf16.msra.mxu1 %v3287_v39 }
  0x3f   :  { %v122_v29 = vld [vmem:[#allocation2 + $0x1c] sm:$0xff]  ;;  %v124_v30 = vld [vmem:[#allocation2 + $0x2a] sm:$0xff]  ;;  %152 = vst [vmem:[#allocation1 + $0x1] ss:$4 sm:$0xff] %v120_v24  ;;  %v3543_v43 = vor.u32 %v4682_v28, %v3542_v27  ;;  %1433 = vmatpush.bf16.msra.mxu2 %v3415_v40  ;;  %v3400_v20 = vld [vmem:[#allocation5 + $0x1f0] sm:$0xf0] }
  0x40   :  { %v3782_v32 = vld [vmem:[#allocation5 + $0x4e0] sm:$0xf]  ;;  %v4742_v33 = vld [vmem:[#allocation5 + $0x4ec] sm:$0xf0]  ;;  %154 = vst [vmem:[#allocation1 + $0x2] ss:$4 sm:$0xff] %v122_v29 }
  0x41   :  { %v3910_v34 = vld [vmem:[#allocation5 + $0x5e0] sm:$0xf]  ;;  %v4774_v35 = vld [vmem:[#allocation5 + $0x5ec] sm:$0xf0]  ;;  %156 = vst [vmem:[#allocation1 + $0x3] ss:$4 sm:$0xff] %v124_v30  ;;  %v3783_v44 = vor.u32 %v4742_v33, %v3782_v32  ;;  %1447 = vmatpush.bf16.msra.mxu3 %v3543_v43  ;;  %v3403_v30 = vor.u32 %v4644_v19, %v3400_v20 }
  0x42   :  { %v3926_v41 = vld [vmem:[#allocation5 + $0x600] sm:$0xf]  ;;  %v4778_v42 = vld [vmem:[#allocation5 + $0x60c] sm:$0xf0]  ;;  %v3911_v45 = vor.u32 %v4774_v35, %v3910_v34  ;;  %v4640_v24 = vld [vmem:[#allocation5 + $0x1c4] sm:$0xf] }
  0x43   :  { %v3766_v47 = vld [vmem:[#allocation5 + $0x4c0] sm:$0xf]  ;;  %v4738_v48 = vld [vmem:[#allocation5 + $0x4cc] sm:$0xf0]  ;;  %v3927_v51 = vor.u32 %v4778_v42, %v3926_v41  ;;  %1454 = vmatpush.bf16.msrb.mxu0 %v3783_v44  ;;  %v3384_v25 = vld [vmem:[#allocation5 + $0x1d0] sm:$0xf0] }
  0x44   :  { %v3894_v49 = vld [vmem:[#allocation5 + $0x5c0] sm:$0xf]  ;;  %v4770_v52 = vld [vmem:[#allocation5 + $0x5cc] sm:$0xf0]  ;;  %v3767_v59 = vor.u32 %v4738_v48, %v3766_v47  ;;  %1468 = vmatpush.bf16.msrb.mxu1 %v3911_v45  ;;  %v4596_v27 = vld [vmem:[#allocation5 + $0x64] sm:$0xf] }
  0x45   :  { %v3750_v56 = vld [vmem:[#allocation5 + $0x4a0] sm:$0xf]  ;;  %v4734_v57 = vld [vmem:[#allocation5 + $0x4ac] sm:$0xf0]  ;;  %1496 = vmatpush.bf16.msrb.mxu3 %v3275_v46  ;;  %v3895_v2 = vor.u32 %v4770_v52, %v3894_v49  ;;  %1489 = vmatpush.bf16.msrb.mxu2 %v3927_v51  ;;  %v3208_v28 = vld [vmem:[#allocation5 + $0x70] sm:$0xf0]  ;;  %v3387_v51 = vor.u32 %v4640_v24, %v3384_v25 }
  0x46   :  { %v3878_v60 = vld [vmem:[#allocation5 + $0x5a0] sm:$0xf]  ;;  %v4766_v61 = vld [vmem:[#allocation5 + $0x5ac] sm:$0xf0]  ;;  %v3751_v7 = vor.u32 %v4734_v57, %v3750_v56  ;;  %v3211_v43 = vor.u32 %v4596_v27, %v3208_v28  ;;  %v119_v45 = vld [vmem:[#allocation2 + $0x8] sm:$0x3f] }
  0x47   :  { %v132_v6 = vld [vmem:[#allocation2 + $0x62] sm:$0xff]  ;;  %1455 = vmatpush.bf16.msrb.mxu0 %v3767_v59  ;;  %v3734_v8 = vld [vmem:[#allocation5 + $0x480] sm:$0xf]  ;;  %v3879_v10 = vor.u32 %v4766_v61, %v3878_v60  ;;  %v121_v46 = vld [vmem:[#allocation2 + $0x16] sm:$0x3f] }
  0x48   :  { %v165_v0 = vld.sshfl [vmem:[#allocation1] sm:$0xff pattern:$0x73625140]  ;;  %v166_v1 = vld.sshfl [vmem:[#allocation1 + $0x8] sm:$0xff pattern:$0x73625140]  ;;  %1469 = vmatpush.bf16.msrb.mxu1 %v3895_v2 }
  0x49   :  { %v167_v4 = vld.sshfl [vmem:[#allocation1 + $0x10] sm:$0xff pattern:$0x73625140]  ;;  %v168_v5 = vld.sshfl [vmem:[#allocation1 + $0x18] sm:$0xff pattern:$0x73625140]  ;;  %1497 = vmatpush.bf16.msrb.mxu3 %v3259_v3 }
  0x4a   :  { %172 = vst [vmem:[#allocation1] ss:$4 sm:$0xff] %v126_v50  ;;  %v4730_v9 = vld [vmem:[#allocation5 + $0x48c] sm:$0xf0]  ;;  %v3862_v12 = vld [vmem:[#allocation5 + $0x580] sm:$0xf] }
  0x4b   :  { %173 = vst [vmem:[#allocation1 + $0x1] ss:$4 sm:$0xff] %v128_v55  ;;  %v4762_v13 = vld [vmem:[#allocation5 + $0x58c] sm:$0xf0]  ;;  %1456 = vmatpush.bf16.msrb.mxu0 %v3751_v7  ;;  %v3735_v16 = vor.u32 %v4730_v9, %v3734_v8  ;;  %v3718_v21 = vld [vmem:[#allocation5 + $0x460] sm:$0xf] }
  0x4c   :  { %174 = vst [vmem:[#allocation1 + $0x2] ss:$4 sm:$0xff] %v130_v58  ;;  %1470 = vmatpush.bf16.msrb.mxu1 %v3879_v10  ;;  %v3863_v17 = vor.u32 %v4762_v13, %v3862_v12  ;;  %v4726_v22 = vld [vmem:[#allocation5 + $0x46c] sm:$0xf0]  ;;  %v3846_v23 = vld [vmem:[#allocation5 + $0x560] sm:$0xf] }
  0x4d   :  { %175 = vst [vmem:[#allocation1 + $0x3] ss:$4 sm:$0xff] %v132_v6  ;;  %1498 = vmatpush.bf16.msrb.mxu3 %v3243_v11  ;;  %v4758_v26 = vld [vmem:[#allocation5 + $0x56c] sm:$0xf0]  ;;  %v3702_v32 = vld [vmem:[#allocation5 + $0x440] sm:$0xf]  ;;  %v3719_v38 = vor.u32 %v4726_v22, %v3718_v21 }
  0x4e   :  { %v4722_v33 = vld [vmem:[#allocation5 + $0x44c] sm:$0xf0]  ;;  %v3830_v39 = vld [vmem:[#allocation5 + $0x540] sm:$0xf]  ;;  %v3847_v42 = vor.u32 %v4758_v26, %v3846_v23  ;;  %v4636_v47 = vld [vmem:[#allocation5 + $0x1a4] sm:$0xf] }
  0x4f   :  { %1457 = vmatpush.bf16.msrb.mxu0 %v3735_v16  ;;  %v4754_v44 = vld [vmem:[#allocation5 + $0x54c] sm:$0xf0]  ;;  %v4592_v48 = vld [vmem:[#allocation5 + $0x44] sm:$0xf]  ;;  %v3192_v49 = vld [vmem:[#allocation5 + $0x50] sm:$0xf0]  ;;  %v3703_v54 = vor.u32 %v4722_v33, %v3702_v32 }
  0x50   :  { %1471 = vmatpush.bf16.msrb.mxu1 %v3863_v17  ;;  %v123_v50 = vld [vmem:[#allocation2 + $0x24] sm:$0x3f]  ;;  %v125_v53 = vld [vmem:[#allocation2 + $0x32] sm:$0x3f]  ;;  %158 = vst [vmem:[#allocation1 + $0x20] ss:$4 sm:$0xff] %v119_v45  ;;  %v3831_v57 = vor.u32 %v4754_v44, %v3830_v39  ;;  %v3195_v58 = vor.u32 %v4592_v48, %v3192_v49 }
  0x51   :  { %1499 = vmatpush.bf16.msrb.mxu3 %v3227_v18  ;;  %v3368_v52 = vld [vmem:[#allocation5 + $0x1b0] sm:$0xf0]  ;;  %v3686_v55 = vld [vmem:[#allocation5 + $0x420] sm:$0xf]  ;;  %v4718_v56 = vld [vmem:[#allocation5 + $0x42c] sm:$0xf0] }
  0x52   :  { %160 = vst [vmem:[#allocation1 + $0x21] ss:$4 sm:$0xff] %v121_v46  ;;  %v3814_v59 = vld [vmem:[#allocation5 + $0x520] sm:$0xf]  ;;  %v4750_v60 = vld [vmem:[#allocation5 + $0x52c] sm:$0xf0]  ;;  %v3371_v63 = vor.u32 %v4636_v47, %v3368_v52  ;;  %v3687_v2 = vor.u32 %v4718_v56, %v3686_v55 }
  0x53   :  { %1458 = vmatpush.bf16.msrb.mxu0 %v3719_v38  ;;  %162 = vst [vmem:[#allocation1 + $0x22] ss:$4 sm:$0xff] %v123_v50  ;;  %v4588_v61 = vld [vmem:[#allocation5 + $0x24] sm:$0xf]  ;;  %v3670_v3 = vld [vmem:[#allocation5 + $0x400] sm:$0xf] }
  0x54   :  { %v182_v29 = vld.sshfl [vmem:[#allocation1 + $0x10] sm:$0xff pattern:$0x73625140]  ;;  %v180_v31 = vld.sshfl [vmem:[#allocation1] sm:$0xff pattern:$0x73625140]  ;;  %1472 = vmatpush.bf16.msrb.mxu1 %v3847_v42 }
  0x55   :  { %v5207_v34 = vpack.c.bf16 %v182_v29, %v167_v4  ;;  %v5209_v35 = vpack.c.bf16 %v180_v31, %v165_v0  ;;  %v183_v36 = vld.sshfl [vmem:[#allocation1 + $0x18] sm:$0xff pattern:$0x73625140]  ;;  %v181_v37 = vld.sshfl [vmem:[#allocation1 + $0x8] sm:$0xff pattern:$0x73625140]  ;;  %1500 = vmatpush.bf16.msrb.mxu3 %v3211_v43  ;;  %v3815_v4 = vor.u32 %v4750_v60, %v3814_v59 }
  0x56   :  { %v5211_v40 = vpack.c.bf16 %v183_v36, %v168_v5  ;;  %v5213_v41 = vpack.c.bf16 %v181_v37, %v166_v1  ;;  %164 = vst [vmem:[#allocation1 + $0x23] ss:$4 sm:$0xff] %v125_v53  ;;  %v4632_v0 = vld [vmem:[#allocation5 + $0x184] sm:$0xf]  ;;  %v3352_v1 = vld [vmem:[#allocation5 + $0x190] sm:$0xf0]  ;;  %v3179_v5 = vor.u32 %v4588_v61, %v3176_v62 }
  0x57   :  { %1434 = vmatmul.bf16.vlgmr.msra.gmra.mxu2 %v5207_v34  ;;  %1406 = vmatmul.bf16.vlgmr.msra.gmra.mxu0 %v5209_v35  ;;  %v4714_v6 = vld [vmem:[#allocation5 + $0x40c] sm:$0xf0]  ;;  %v3798_v7 = vld [vmem:[#allocation5 + $0x500] sm:$0xf]  ;;  %v4628_v9 = vld [vmem:[#allocation5 + $0x164] sm:$0xf]  ;;  %v3355_v15 = vor.u32 %v4632_v0, %v3352_v1 }
  0x58   :  { %1510 = vmatpush.bf16.msra.mxu2 %v3403_v30  ;;  %1448 = vmatmul.bf16.vlgmr.msra.gmra.mxu3 %v5211_v40  ;;  %v4746_v8 = vld [vmem:[#allocation5 + $0x50c] sm:$0xf0]  ;;  %v3336_v10 = vld [vmem:[#allocation5 + $0x170] sm:$0xf0]  ;;  %v4584_v12 = vld [vmem:[#allocation5 + $0x4] sm:$0xf]  ;;  %v3671_v21 = vor.u32 %v4714_v6, %v3670_v3 }
  0x59   :  { %1420 = vmatmul.bf16.vlgmr.msra.gmra.mxu1 %v5213_v41  ;;  %1459 = vmatpush.bf16.msrb.mxu0 %v3703_v54  ;;  %v127_v11 = vld [vmem:[#allocation2 + $0x40] sm:$0x3f]  ;;  %v4676_v14 = vld [vmem:[#allocation5 + $0x2e4] sm:$0xf]  ;;  %v129_v16 = vld [vmem:[#allocation2 + $0x4e] sm:$0x3f]  ;;  %v3799_v27 = vor.u32 %v4746_v8, %v3798_v7  ;;  %v3339_v38 = vor.u32 %v4628_v9, %v3336_v10 }
  0x5a   :  { %1473 = vmatpush.bf16.msrb.mxu1 %v3831_v57  ;;  %1501 = vmatpush.bf16.msrb.mxu3 %v3195_v58  ;;  %v3160_v13 = vld [vmem:[#allocation5 + $0x10] sm:$0xf0]  ;;  %v4708_v18 = vld [vmem:[#allocation5 + $0x3e4] sm:$0xf]  ;;  %v131_v20 = vld [vmem:[#allocation2 + $0x5c] sm:$0x3f] }
  0x5b   :  { %v3528_v17 = vld [vmem:[#allocation5 + $0x2f0] sm:$0xf0]  ;;  %v4740_v22 = vld [vmem:[#allocation5 + $0x4e4] sm:$0xf]  ;;  %v133_v24 = vld [vmem:[#allocation2 + $0x6a] sm:$0x3f]  ;;  %v3163_v28 = vor.u32 %v4584_v12, %v3160_v13 }
  0x5c   :  { %1511 = vmatpush.bf16.msra.mxu2 %v3387_v51  ;;  %v3656_v19 = vld [vmem:[#allocation5 + $0x3f0] sm:$0xf0]  ;;  %v4672_v29 = vld [vmem:[#allocation5 + $0x2c4] sm:$0xf]  ;;  %v3531_v33 = vor.u32 %v4676_v14, %v3528_v17 }
  0x5d   :  { %1460 = vmatpush.bf16.msrb.mxu0 %v3687_v2  ;;  %v3784_v23 = vld [vmem:[#allocation5 + $0x4f0] sm:$0xf0]  ;;  %v5219_v25 = vld.sshfl [vmem:[#allocation1 + $0x20] sm:$0xff pattern:$0x73625140]  ;;  %v3659_v36 = vor.u32 %v4708_v18, %v3656_v19 }
  0x5e   :  { %1474 = vmatpush.bf16.msrb.mxu1 %v3815_v4  ;;  %v5221_v26 = vld.sshfl [vmem:[#allocation1 + $0x28] sm:$0xff pattern:$0x73625140]  ;;  %1502 = vmatpush.bf16.msrb.mxu3 %v3179_v5  ;;  %v4624_v30 = vld [vmem:[#allocation5 + $0x144] sm:$0xf]  ;;  %v3787_v39 = vor.u32 %v4740_v22, %v3784_v23 }
  0x5f   :  { %v3320_v31 = vld [vmem:[#allocation5 + $0x150] sm:$0xf0]  ;;  %v171_v32 = vld.sshfl [vmem:[#allocation1 + $0x30] sm:$0xff pattern:$0x73625140] }
  0x60   :  { %1512 = vmatpush.bf16.msra.mxu2 %v3371_v63  ;;  %v3512_v37 = vld [vmem:[#allocation5 + $0x2d0] sm:$0xf0]  ;;  %176 = vst [vmem:[#allocation1 + $0x20] ss:$4 sm:$0xff] %v127_v11  ;;  %v4704_v42 = vld [vmem:[#allocation5 + $0x3c4] sm:$0xf]  ;;  %v3323_v50 = vor.u32 %v4624_v30, %v3320_v31 }
  0x61   :  { %v3640_v43 = vld [vmem:[#allocation5 + $0x3d0] sm:$0xf0]  ;;  %177 = vst [vmem:[#allocation1 + $0x21] ss:$4 sm:$0xff] %v129_v16  ;;  %1461 = vmatpush.bf16.msrb.mxu0 %v3671_v21  ;;  %v4736_v44 = vld [vmem:[#allocation5 + $0x4c4] sm:$0xf]  ;;  %v3515_v47 = vor.u32 %v4672_v29, %v3512_v37 }
  0x62   :  { %v3768_v45 = vld [vmem:[#allocation5 + $0x4d0] sm:$0xf0]  ;;  %178 = vst [vmem:[#allocation1 + $0x22] ss:$4 sm:$0xff] %v131_v20  ;;  %1475 = vmatpush.bf16.msrb.mxu1 %v3799_v27  ;;  %1503 = vmatpush.bf16.msrb.mxu3 %v3163_v28  ;;  %v4620_v46 = vld [vmem:[#allocation5 + $0x124] sm:$0xf]  ;;  %v3643_v48 = vor.u32 %v4704_v42, %v3640_v43 }
  0x63   :  { %179 = vst [vmem:[#allocation1 + $0x23] ss:$4 sm:$0xff] %v133_v24  ;;  %v4668_v49 = vld [vmem:[#allocation5 + $0x2a4] sm:$0xf]  ;;  %v3771_v51 = vor.u32 %v4736_v44, %v3768_v45  ;;  %v3496_v52 = vld [vmem:[#allocation5 + $0x2b0] sm:$0xf0] }
  0x64   :  { %1513 = vmatpush.bf16.msra.mxu2 %v3355_v15  ;;  %v4700_v53 = vld [vmem:[#allocation5 + $0x3a4] sm:$0xf]  ;;  %v3624_v54 = vld [vmem:[#allocation5 + $0x3b0] sm:$0xf0]  ;;  %v3499_v60 = vor.u32 %v4668_v49, %v3496_v52 }
  0x65   :  { %1524 = vmatpush.bf16.msra.mxu0 %v3531_v33  ;;  %v3304_v55 = vld [vmem:[#allocation5 + $0x130] sm:$0xf0]  ;;  %v4732_v56 = vld [vmem:[#allocation5 + $0x4a4] sm:$0xf]  ;;  %v3627_v61 = vor.u32 %v4700_v53, %v3624_v54 }
  0x66   :  { %1538 = vmatpush.bf16.msra.mxu1 %v3659_v36  ;;  %1552 = vmatpush.bf16.msra.mxu3 %v3787_v39  ;;  %v3752_v57 = vld [vmem:[#allocation5 + $0x4b0] sm:$0xf0]  ;;  %v4616_v58 = vld [vmem:[#allocation5 + $0x104] sm:$0xf]  ;;  %v3307_v0 = vor.u32 %v4620_v46, %v3304_v55 }
  0x67   :  { %v3288_v59 = vld [vmem:[#allocation5 + $0x110] sm:$0xf0]  ;;  %v4664_v62 = vld [vmem:[#allocation5 + $0x284] sm:$0xf]  ;;  %v3755_v2 = vor.u32 %v4732_v56, %v3752_v57 }
  0x68   :  { %1514 = vmatpush.bf16.msra.mxu2 %v3339_v38  ;;  %1504 = vmatmul.bf16.vlgmr.msrb.gmra.mxu3 %v5209_v35  ;;  %v3480_v63 = vld [vmem:[#allocation5 + $0x290] sm:$0xf0]  ;;  %v4772_v1 = vld [vmem:[#allocation5 + $0x5e4] sm:$0xf]  ;;  %v3291_v16 = vor.u32 %v4616_v58, %v3288_v59 }
  0x69   :  { %1525 = vmatpush.bf16.msra.mxu0 %v3515_v47  ;;  %v4696_v3 = vld [vmem:[#allocation5 + $0x384] sm:$0xf]  ;;  %v3608_v4 = vld [vmem:[#allocation5 + $0x390] sm:$0xf0]  ;;  %v3483_v10 = vor.u32 %v4664_v62, %v3480_v63 }
  0x6a   :  { %1539 = vmatpush.bf16.msra.mxu1 %v3643_v48  ;;  %1553 = vmatpush.bf16.msra.mxu3 %v3771_v51  ;;  %v3912_v5 = vld [vmem:[#allocation5 + $0x5f0] sm:$0xf0]  ;;  %v4728_v6 = vld [vmem:[#allocation5 + $0x484] sm:$0xf]  ;;  %v3611_v14 = vor.u32 %v4696_v3, %v3608_v4 }
  0x6b   :  { %v3736_v7 = vld [vmem:[#allocation5 + $0x490] sm:$0xf0]  ;;  %v186_v8 = vld.sshfl [vmem:[#allocation1 + $0x30] sm:$0xff pattern:$0x73625140]  ;;  %v3915_v22 = vor.u32 %v4772_v1, %v3912_v5 }
  0x6c   :  { %1515 = vmatpush.bf16.msra.mxu2 %v3323_v50  ;;  %v184_v9 = vld.sshfl [vmem:[#allocation1 + $0x20] sm:$0xff pattern:$0x73625140]  ;;  %v5224_v11 = vpack.c.bf16 %v186_v8, %v171_v32  ;;  %v185_v13 = vld.sshfl [vmem:[#allocation1 + $0x28] sm:$0xff pattern:$0x73625140]  ;;  %v3739_v18 = vor.u32 %v4728_v6, %v3736_v7 }
  0x6d   :  { %v5227_v12 = vpack.c.bf16 %v184_v9, %v5219_v25  ;;  %1526 = vmatpush.bf16.msra.mxu0 %v3499_v60  ;;  %v4660_v15 = vld [vmem:[#allocation5 + $0x264] sm:$0xf]  ;;  %v5230_v17 = vpack.c.bf16 %v185_v13, %v5221_v26  ;;  %v3464_v19 = vld [vmem:[#allocation5 + $0x270] sm:$0xf0]  ;;  %v4615_v1 = vld [vmem:[#allocation5 + $0xf4] sm:$0xf0] }
  0x6e   :  { %1540 = vmatpush.bf16.msra.mxu1 %v3627_v61  ;;  %1554 = vmatpush.bf16.msra.mxu3 %v3755_v2  ;;  %v4692_v20 = vld [vmem:[#allocation5 + $0x364] sm:$0xf]  ;;  %v3592_v21 = vld [vmem:[#allocation5 + $0x370] sm:$0xf0]  ;;  %v3467_v26 = vor.u32 %v4660_v15, %v3464_v19  ;;  %v3534_v5 = vld [vmem:[#allocation5 + $0x2e8] sm:$0xf] }
  0x6f   :  { %3940 = vmatmul.msk.bf16.vlgmr.msrb.gmra.mxu2 %vm1394_vm0, %v5224_v11  ;;  %1462 = vmatmul.bf16.vlgmr.msrb.gmra.mxu0 %v5227_v12  ;;  %v4724_v23 = vld [vmem:[#allocation5 + $0x464] sm:$0xf]  ;;  %v3720_v24 = vld [vmem:[#allocation5 + $0x470] sm:$0xf0]  ;;  %v3595_v28 = vor.u32 %v4692_v20, %v3592_v21  ;;  %v4679_v6 = vld [vmem:[#allocation5 + $0x2f4] sm:$0xf0] }
  0x70   :  { %1516 = vmatpush.bf16.msra.mxu2 %v3307_v0  ;;  %1476 = vmatmul.bf16.vlgmr.msrb.gmra.mxu1 %v5230_v17  ;;  %v4768_v25 = vld [vmem:[#allocation5 + $0x5c4] sm:$0xf]  ;;  %v3896_v27 = vld [vmem:[#allocation5 + $0x5d0] sm:$0xf0]  ;;  %v3723_v30 = vor.u32 %v4724_v23, %v3720_v24  ;;  %v3278_v0 = vld [vmem:[#allocation5 + $0xe8] sm:$0xf]  ;;  %v3535_v19 = vor.u32 %v4679_v6, %v3534_v5 }
  0x71   :  { %1527 = vmatpush.bf16.msra.mxu0 %v3483_v10  ;;  %v4656_v29 = vld [vmem:[#allocation5 + $0x244] sm:$0xf]  ;;  %v3448_v31 = vld [vmem:[#allocation5 + $0x250] sm:$0xf0]  ;;  %v3899_v36 = vor.u32 %v4768_v25, %v3896_v27  ;;  %v3406_v15 = vld [vmem:[#allocation5 + $0x1e8] sm:$0xf] }
  0x72   :  { %1541 = vmatpush.bf16.msra.mxu1 %v3611_v14  ;;  %1555 = vmatpush.bf16.msra.mxu3 %v3739_v18  ;;  %v4688_v32 = vld [vmem:[#allocation5 + $0x344] sm:$0xf]  ;;  %v3576_v33 = vld [vmem:[#allocation5 + $0x350] sm:$0xf0]  ;;  %v3451_v43 = vor.u32 %v4656_v29, %v3448_v31  ;;  %v3279_v14 = vor.u32 %v4615_v1, %v3278_v0  ;;  %v4647_v18 = vld [vmem:[#allocation5 + $0x1f4] sm:$0xf0] }
  0x73   :  { %v4720_v37 = vld [vmem:[#allocation5 + $0x444] sm:$0xf]  ;;  %v3704_v38 = vld [vmem:[#allocation5 + $0x450] sm:$0xf0]  ;;  %v3579_v44 = vor.u32 %v4688_v32, %v3576_v33  ;;  %v3262_v20 = vld [vmem:[#allocation5 + $0xc8] sm:$0xf] }
  0x74   :  { %1517 = vmatpush.bf16.msra.mxu2 %v3291_v16  ;;  %v4764_v39 = vld [vmem:[#allocation5 + $0x5a4] sm:$0xf]  ;;  %v3880_v42 = vld [vmem:[#allocation5 + $0x5b0] sm:$0xf0]  ;;  %v3707_v46 = vor.u32 %v4720_v37, %v3704_v38  ;;  %v4611_v21 = vld [vmem:[#allocation5 + $0xd4] sm:$0xf0] }
  0x75   :  { %1528 = vmatpush.bf16.msra.mxu0 %v3467_v26  ;;  %v4652_v45 = vld [vmem:[#allocation5 + $0x224] sm:$0xf]  ;;  %v3432_v47 = vld [vmem:[#allocation5 + $0x230] sm:$0xf0]  ;;  %v3883_v50 = vor.u32 %v4764_v39, %v3880_v42  ;;  %v3518_v23 = vld [vmem:[#allocation5 + $0x2c8] sm:$0xf]  ;;  %v3407_v26 = vor.u32 %v4647_v18, %v3406_v15 }
  0x76   :  { %1542 = vmatpush.bf16.msra.mxu1 %v3595_v28  ;;  %1556 = vmatpush.bf16.msra.mxu3 %v3723_v30  ;;  %v4684_v48 = vld [vmem:[#allocation5 + $0x324] sm:$0xf]  ;;  %v3560_v49 = vld [vmem:[#allocation5 + $0x330] sm:$0xf0]  ;;  %v3435_v55 = vor.u32 %v4652_v45, %v3432_v47  ;;  %v4675_v24 = vld [vmem:[#allocation5 + $0x2d4] sm:$0xf0]  ;;  %v3263_v28 = vor.u32 %v4611_v21, %v3262_v20 }
  0x77   :  { %v4716_v51 = vld [vmem:[#allocation5 + $0x424] sm:$0xf]  ;;  %v3688_v52 = vld [vmem:[#allocation5 + $0x430] sm:$0xf0]  ;;  %v3563_v56 = vor.u32 %v4684_v48, %v3560_v49  ;;  %v3390_v29 = vld [vmem:[#allocation5 + $0x1c8] sm:$0xf]  ;;  %v3519_v31 = vor.u32 %v4675_v24, %v3518_v23 }
  0x78   :  { %1566 = vmatpush.bf16.msrb.mxu2 %v3915_v22  ;;  %v4760_v53 = vld [vmem:[#allocation5 + $0x584] sm:$0xf]  ;;  %v3864_v54 = vld [vmem:[#allocation5 + $0x590] sm:$0xf0]  ;;  %v3691_v60 = vor.u32 %v4716_v51, %v3688_v52  ;;  %v4643_v30 = vld [vmem:[#allocation5 + $0x1d4] sm:$0xf0] }
  0x79   :  { %1529 = vmatpush.bf16.msra.mxu0 %v3451_v43  ;;  %v4648_v57 = vld [vmem:[#allocation5 + $0x204] sm:$0xf]  ;;  %v3416_v58 = vld [vmem:[#allocation5 + $0x210] sm:$0xf0]  ;;  %v3867_v3 = vor.u32 %v4760_v53, %v3864_v54  ;;  %v3246_v32 = vld [vmem:[#allocation5 + $0xa8] sm:$0xf]  ;;  %v3391_v43 = vor.u32 %v4643_v30, %v3390_v29 }
  0x7a   :  { %1543 = vmatpush.bf16.msra.mxu1 %v3579_v44  ;;  %v4680_v59 = vld [vmem:[#allocation5 + $0x304] sm:$0xf]  ;;  %1557 = vmatpush.bf16.msra.mxu3 %v3707_v46  ;;  %v3544_v61 = vld [vmem:[#allocation5 + $0x310] sm:$0xf0]  ;;  %v3419_v9 = vor.u32 %v4648_v57, %v3416_v58  ;;  %v4607_v33 = vld [vmem:[#allocation5 + $0xb4] sm:$0xf0] }
  0x7b   :  { %v4712_v62 = vld [vmem:[#allocation5 + $0x404] sm:$0xf]  ;;  %v3672_v63 = vld [vmem:[#allocation5 + $0x410] sm:$0xf0]  ;;  %v3547_v10 = vor.u32 %v4680_v59, %v3544_v61  ;;  %v3502_v37 = vld [vmem:[#allocation5 + $0x2a8] sm:$0xf]  ;;  %v3247_v44 = vor.u32 %v4607_v33, %v3246_v32 }
  0x7c   :  { %1567 = vmatpush.bf16.msrb.mxu2 %v3899_v36  ;;  %v4776_v2 = vld [vmem:[#allocation5 + $0x604] sm:$0xf]  ;;  %v3928_v4 = vld [vmem:[#allocation5 + $0x610] sm:$0xf0]  ;;  %v3675_v13 = vor.u32 %v4712_v62, %v3672_v63  ;;  %v4671_v38 = vld [vmem:[#allocation5 + $0x2b4] sm:$0xf0] }
  0x7d   :  { %v4756_v7 = vld [vmem:[#allocation5 + $0x564] sm:$0xf]  ;;  %v3848_v8 = vld [vmem:[#allocation5 + $0x570] sm:$0xf0]  ;;  %1530 = vmatpush.bf16.msra.mxu0 %v3435_v55  ;;  %v3931_v16 = vor.u32 %v4776_v2, %v3928_v4  ;;  %v3374_v45 = vld [vmem:[#allocation5 + $0x1a8] sm:$0xf]  ;;  %v3503_v47 = vor.u32 %v4671_v38, %v3502_v37 }
  0x7e   :  { %1544 = vmatpush.bf16.msra.mxu1 %v3563_v56  ;;  %1558 = vmatpush.bf16.msra.mxu3 %v3691_v60  ;;  %v3851_v22 = vor.u32 %v4756_v7, %v3848_v8  ;;  %v4752_v25 = vld [vmem:[#allocation5 + $0x544] sm:$0xf]  ;;  %v3832_v27 = vld [vmem:[#allocation5 + $0x550] sm:$0xf0]  ;;  %v4639_v46 = vld [vmem:[#allocation5 + $0x1b4] sm:$0xf0] }
  0x7f   :  { %1518 = vmatmul.bf16.vlgmr.msra.gmra.mxu2 %v5213_v41  ;;  %v3835_v36 = vor.u32 %v4752_v25, %v3832_v27  ;;  %v4748_v39 = vld [vmem:[#allocation5 + $0x524] sm:$0xf]  ;;  %v3816_v42 = vld [vmem:[#allocation5 + $0x530] sm:$0xf0]  ;;  %v3230_v48 = vld [vmem:[#allocation5 + $0x88] sm:$0xf]  ;;  %v3375_v57 = vor.u32 %v4639_v46, %v3374_v45 }
  0x80   :  { %1568 = vmatpush.bf16.msrb.mxu2 %v3883_v50  ;;  %v4603_v49 = vld [vmem:[#allocation5 + $0x94] sm:$0xf0]  ;;  %v3819_v50 = vor.u32 %v4748_v39, %v3816_v42  ;;  %v3486_v51 = vld [vmem:[#allocation5 + $0x288] sm:$0xf]  ;;  %v4744_v53 = vld [vmem:[#allocation5 + $0x504] sm:$0xf] }
  0x81   :  { %1531 = vmatpush.bf16.msra.mxu0 %v3419_v9  ;;  %v4667_v52 = vld [vmem:[#allocation5 + $0x294] sm:$0xf0]  ;;  %v3800_v54 = vld [vmem:[#allocation5 + $0x510] sm:$0xf0]  ;;  %v3662_v55 = vld [vmem:[#allocation5 + $0x3e8] sm:$0xf]  ;;  %v3231_v58 = vor.u32 %v4603_v49, %v3230_v48 }
  0x82   :  { %1545 = vmatpush.bf16.msra.mxu1 %v3547_v10  ;;  %1559 = vmatpush.bf16.msra.mxu3 %v3675_v13  ;;  %v4711_v56 = vld [vmem:[#allocation5 + $0x3f4] sm:$0xf0]  ;;  %v3358_v59 = vld [vmem:[#allocation5 + $0x188] sm:$0xf]  ;;  %v3487_v61 = vor.u32 %v4667_v52, %v3486_v51  ;;  %v3803_v0 = vor.u32 %v4744_v53, %v3800_v54 }
  0x83   :  { %v4635_v60 = vld [vmem:[#allocation5 + $0x194] sm:$0xf0]  ;;  %v3214_v62 = vld [vmem:[#allocation5 + $0x68] sm:$0xf] }
  0x84   :  { %1569 = vmatpush.bf16.msrb.mxu2 %v3867_v3  ;;  %1532 = vmatmul.bf16.vlgmr.msra.gmra.mxu0 %v5207_v34  ;;  %v4599_v63 = vld [vmem:[#allocation5 + $0x74] sm:$0xf0]  ;;  %v3470_v1 = vld [vmem:[#allocation5 + $0x268] sm:$0xf]  ;;  %v3663_v3 = vor.u32 %v4711_v56, %v3662_v55  ;;  %v3359_v6 = vor.u32 %v4635_v60, %v3358_v59 }
  0x85   :  { %1622 = vmatpush.bf16.msrb.mxu0 %v3535_v19  ;;  %1560 = vmatmul.bf16.vlgmr.msra.gmra.mxu3 %v5227_v12  ;;  %v4663_v2 = vld [vmem:[#allocation5 + $0x274] sm:$0xf0]  ;;  %v3646_v4 = vld [vmem:[#allocation5 + $0x3c8] sm:$0xf]  ;;  %v3215_v7 = vor.u32 %v4599_v63, %v3214_v62 }
  0x86   :  { %1594 = vmatpush.bf16.msrb.mxu1 %v3279_v14  ;;  %1587 = vmatpush.bf16.msrb.mxu3 %v3931_v16  ;;  %v4707_v5 = vld [vmem:[#allocation5 + $0x3d4] sm:$0xf0]  ;;  %v3342_v8 = vld [vmem:[#allocation5 + $0x168] sm:$0xf]  ;;  %v3471_v10 = vor.u32 %v4663_v2, %v3470_v1  ;;  %v4645_v1 = vld [vmem:[#allocation5 + $0x1ec] sm:$0xf] }
  0x87   :  { %1546 = vmatmul.bf16.vlgmr.msra.gmra.mxu1 %v5211_v40  ;;  %v4631_v9 = vld [vmem:[#allocation5 + $0x174] sm:$0xf0]  ;;  %v3198_v13 = vld [vmem:[#allocation5 + $0x48] sm:$0xf]  ;;  %v3647_v18 = vor.u32 %v4707_v5, %v3646_v4  ;;  %v3408_v2 = vld [vmem:[#allocation5 + $0x1f8] sm:$0xf0] }
  0x88   :  { %1570 = vmatpush.bf16.msrb.mxu2 %v3851_v22  ;;  %v4595_v14 = vld [vmem:[#allocation5 + $0x54] sm:$0xf0]  ;;  %v3454_v15 = vld [vmem:[#allocation5 + $0x248] sm:$0xf]  ;;  %v3343_v21 = vor.u32 %v4631_v9, %v3342_v8  ;;  %v3411_v9 = vor.u32 %v4645_v1, %v3408_v2 }
  0x89   :  { %1623 = vmatpush.bf16.msrb.mxu0 %v3519_v31  ;;  %v4659_v16 = vld [vmem:[#allocation5 + $0x254] sm:$0xf0]  ;;  %v3630_v19 = vld [vmem:[#allocation5 + $0x3a8] sm:$0xf]  ;;  %v3199_v22 = vor.u32 %v4595_v14, %v3198_v13 }
  0x8a   :  { %1608 = vmatpush.bf16.msra.mxu3 %v3407_v26  ;;  %1595 = vmatpush.bf16.msrb.mxu1 %v3263_v28  ;;  %v4703_v20 = vld [vmem:[#allocation5 + $0x3b4] sm:$0xf0]  ;;  %v3326_v23 = vld [vmem:[#allocation5 + $0x148] sm:$0xf]  ;;  %v3455_v25 = vor.u32 %v4659_v16, %v3454_v15  ;;  %v4641_v16 = vld [vmem:[#allocation5 + $0x1cc] sm:$0xf] }
  0x8b   :  { %v4627_v24 = vld [vmem:[#allocation5 + $0x154] sm:$0xf0]  ;;  %v3182_v27 = vld [vmem:[#allocation5 + $0x28] sm:$0xf]  ;;  %v3631_v30 = vor.u32 %v4703_v20, %v3630_v19 }
  0x8c   :  { %1571 = vmatpush.bf16.msrb.mxu2 %v3835_v36  ;;  %v4591_v26 = vld [vmem:[#allocation5 + $0x34] sm:$0xf0]  ;;  %v3438_v28 = vld [vmem:[#allocation5 + $0x228] sm:$0xf]  ;;  %v3327_v33 = vor.u32 %v4627_v24, %v3326_v23 }
  0x8d   :  { %1624 = vmatpush.bf16.msrb.mxu0 %v3503_v47  ;;  %v4655_v29 = vld [vmem:[#allocation5 + $0x234] sm:$0xf0]  ;;  %v3614_v31 = vld [vmem:[#allocation5 + $0x388] sm:$0xf]  ;;  %v3183_v36 = vor.u32 %v4591_v26, %v3182_v27 }
  0x8e   :  { %1609 = vmatpush.bf16.msra.mxu3 %v3391_v43  ;;  %1596 = vmatpush.bf16.msrb.mxu1 %v3247_v44  ;;  %v4699_v32 = vld [vmem:[#allocation5 + $0x394] sm:$0xf0]  ;;  %v3310_v37 = vld [vmem:[#allocation5 + $0x128] sm:$0xf]  ;;  %v3439_v39 = vor.u32 %v4655_v29, %v3438_v28  ;;  %v4637_v29 = vld [vmem:[#allocation5 + $0x1ac] sm:$0xf] }
  0x8f   :  { %v4623_v38 = vld [vmem:[#allocation5 + $0x134] sm:$0xf0]  ;;  %v3166_v42 = vld [vmem:[#allocation5 + $0x8] sm:$0xf]  ;;  %v3615_v48 = vor.u32 %v4699_v32, %v3614_v31 }
  0x90   :  { %1572 = vmatpush.bf16.msrb.mxu2 %v3819_v50  ;;  %v4587_v43 = vld [vmem:[#allocation5 + $0x14] sm:$0xf0]  ;;  %v3790_v44 = vld [vmem:[#allocation5 + $0x4e8] sm:$0xf]  ;;  %v3311_v53 = vor.u32 %v4623_v38, %v3310_v37 }
  0x91   :  { %1625 = vmatpush.bf16.msrb.mxu0 %v3487_v61  ;;  %v4743_v45 = vld [vmem:[#allocation5 + $0x4f4] sm:$0xf0]  ;;  %v3422_v46 = vld [vmem:[#allocation5 + $0x208] sm:$0xf]  ;;  %v3167_v54 = vor.u32 %v4587_v43, %v3166_v42 }
  0x92   :  { %1610 = vmatpush.bf16.msra.mxu3 %v3375_v57  ;;  %1597 = vmatpush.bf16.msrb.mxu1 %v3231_v58  ;;  %v4651_v47 = vld [vmem:[#allocation5 + $0x214] sm:$0xf0]  ;;  %v3934_v49 = vld [vmem:[#allocation5 + $0x608] sm:$0xf]  ;;  %v3791_v55 = vor.u32 %v4743_v45, %v3790_v44 }
  0x93   :  { %v4779_v50 = vld [vmem:[#allocation5 + $0x614] sm:$0xf0]  ;;  %v3598_v51 = vld [vmem:[#allocation5 + $0x368] sm:$0xf]  ;;  %v3423_v58 = vor.u32 %v4651_v47, %v3422_v46  ;;  %v4633_v47 = vld [vmem:[#allocation5 + $0x18c] sm:$0xf] }
  0x94   :  { %1573 = vmatpush.bf16.msrb.mxu2 %v3803_v0  ;;  %v4695_v52 = vld [vmem:[#allocation5 + $0x374] sm:$0xf0]  ;;  %v3294_v56 = vld [vmem:[#allocation5 + $0x108] sm:$0xf]  ;;  %v3935_v63 = vor.u32 %v4779_v50, %v3934_v49  ;;  %v4609_v50 = vld [vmem:[#allocation5 + $0xcc] sm:$0xf] }
  0x95   :  { %1626 = vmatpush.bf16.msrb.mxu0 %v3471_v10  ;;  %3941 = vmatmul.msk.bf16.vlgmr.msrb.gmra.mxu3 %vm1394_vm0, %v5224_v11  ;;  %v4619_v57 = vld [vmem:[#allocation5 + $0x114] sm:$0xf0]  ;;  %v3918_v59 = vld [vmem:[#allocation5 + $0x5e8] sm:$0xf]  ;;  %v3599_v0 = vor.u32 %v4695_v52, %v3598_v51  ;;  %v3264_v51 = vld [vmem:[#allocation5 + $0xd8] sm:$0xf0] }
  0x96   :  { %1611 = vmatpush.bf16.msra.mxu3 %v3359_v6  ;;  %1598 = vmatpush.bf16.msrb.mxu1 %v3215_v7  ;;  %v4775_v60 = vld [vmem:[#allocation5 + $0x5f4] sm:$0xf0]  ;;  %v3774_v61 = vld [vmem:[#allocation5 + $0x4c8] sm:$0xf]  ;;  %v3295_v5 = vor.u32 %v4619_v57, %v3294_v56 }
  0x97   :  { %1574 = vmatmul.bf16.vlgmr.msrb.gmra.mxu2 %v5230_v17  ;;  %v4739_v62 = vld [vmem:[#allocation5 + $0x4d4] sm:$0xf0]  ;;  %v3919_v6 = vor.u32 %v4775_v60, %v3918_v59  ;;  %v3902_v8 = vld [vmem:[#allocation5 + $0x5c8] sm:$0xf]  ;;  %v4629_v59 = vld [vmem:[#allocation5 + $0x16c] sm:$0xf] }
  0x98   :  { %1636 = vmatpush.bf16.msra.mxu2 %v3663_v3  ;;  %v3582_v3 = vld [vmem:[#allocation5 + $0x348] sm:$0xf]  ;;  %v4691_v4 = vld [vmem:[#allocation5 + $0x354] sm:$0xf0]  ;;  %v3775_v7 = vor.u32 %v4739_v62, %v3774_v61  ;;  %v3344_v60 = vld [vmem:[#allocation5 + $0x178] sm:$0xf0]  ;;  %v3267_v61 = vor.u32 %v4609_v50, %v3264_v51 }
  0x99   :  { %1627 = vmatpush.bf16.msrb.mxu0 %v3455_v25  ;;  %v4771_v10 = vld [vmem:[#allocation5 + $0x5d4] sm:$0xf0]  ;;  %v3758_v13 = vld [vmem:[#allocation5 + $0x4a8] sm:$0xf]  ;;  %v3583_v15 = vor.u32 %v4691_v4, %v3582_v3  ;;  %v4605_v62 = vld [vmem:[#allocation5 + $0xac] sm:$0xf]  ;;  %v3347_v3 = vor.u32 %v4629_v59, %v3344_v60 }
  0x9a   :  { %1612 = vmatpush.bf16.msra.mxu3 %v3343_v21  ;;  %1599 = vmatpush.bf16.msrb.mxu1 %v3199_v22  ;;  %v4735_v14 = vld [vmem:[#allocation5 + $0x4b4] sm:$0xf0]  ;;  %v3566_v19 = vld [vmem:[#allocation5 + $0x328] sm:$0xf]  ;;  %v3903_v21 = vor.u32 %v4771_v10, %v3902_v8  ;;  %v3328_v8 = vld [vmem:[#allocation5 + $0x158] sm:$0xf0] }
  0x9b   :  { %v4687_v20 = vld [vmem:[#allocation5 + $0x334] sm:$0xf0]  ;;  %v3759_v22 = vor.u32 %v4735_v14, %v3758_v13  ;;  %v3886_v23 = vld [vmem:[#allocation5 + $0x5a8] sm:$0xf]  ;;  %v4601_v10 = vld [vmem:[#allocation5 + $0x8c] sm:$0xf] }
  0x9c   :  { %1637 = vmatpush.bf16.msra.mxu2 %v3647_v18  ;;  %v3392_v18 = vld [vmem:[#allocation5 + $0x1d8] sm:$0xf0]  ;;  %v4767_v25 = vld [vmem:[#allocation5 + $0x5b4] sm:$0xf0]  ;;  %v3742_v27 = vld [vmem:[#allocation5 + $0x488] sm:$0xf]  ;;  %v3567_v28 = vor.u32 %v4687_v20, %v3566_v19 }
  0x9d   :  { %1628 = vmatpush.bf16.msrb.mxu0 %v3439_v39  ;;  %v3395_v24 = vor.u32 %v4641_v16, %v3392_v18  ;;  %v4731_v26 = vld [vmem:[#allocation5 + $0x494] sm:$0xf0]  ;;  %v3550_v31 = vld [vmem:[#allocation5 + $0x308] sm:$0xf]  ;;  %v3887_v37 = vor.u32 %v4767_v25, %v3886_v23  ;;  %v3232_v13 = vld [vmem:[#allocation5 + $0x98] sm:$0xf0] }
  0x9e   :  { %1613 = vmatpush.bf16.msra.mxu3 %v3327_v33  ;;  %1600 = vmatpush.bf16.msrb.mxu1 %v3183_v36  ;;  %v4683_v32 = vld [vmem:[#allocation5 + $0x314] sm:$0xf0]  ;;  %v4613_v33 = vld [vmem:[#allocation5 + $0xec] sm:$0xf]  ;;  %v3280_v36 = vld [vmem:[#allocation5 + $0xf8] sm:$0xf0]  ;;  %v3743_v38 = vor.u32 %v4731_v26, %v3742_v27  ;;  %v3235_v27 = vor.u32 %v4601_v10, %v3232_v13 }
  0x9f   :  { %v3870_v39 = vld [vmem:[#allocation5 + $0x588] sm:$0xf]  ;;  %v4763_v43 = vld [vmem:[#allocation5 + $0x594] sm:$0xf0]  ;;  %v3551_v46 = vor.u32 %v4683_v32, %v3550_v31  ;;  %v3283_v49 = vor.u32 %v4613_v33, %v3280_v36  ;;  %v3536_v23 = vld [vmem:[#allocation5 + $0x2f8] sm:$0xf0] }
  0xa0   :  { %1638 = vmatpush.bf16.msra.mxu2 %v3631_v30  ;;  %v3376_v30 = vld [vmem:[#allocation5 + $0x1b8] sm:$0xf0]  ;;  %v3726_v44 = vld [vmem:[#allocation5 + $0x468] sm:$0xf]  ;;  %v4727_v45 = vld [vmem:[#allocation5 + $0x474] sm:$0xf0]  ;;  %v3871_v52 = vor.u32 %v4763_v43, %v3870_v39 }
  0xa1   :  { %1629 = vmatpush.bf16.msrb.mxu0 %v3423_v58  ;;  %v3379_v42 = vor.u32 %v4637_v29, %v3376_v30  ;;  %v4759_v56 = vld [vmem:[#allocation5 + $0x574] sm:$0xf0]  ;;  %v3710_v57 = vld [vmem:[#allocation5 + $0x448] sm:$0xf]  ;;  %v3312_v25 = vld [vmem:[#allocation5 + $0x138] sm:$0xf0] }
  0xa2   :  { %1614 = vmatpush.bf16.msra.mxu3 %v3311_v53  ;;  %1601 = vmatpush.bf16.msrb.mxu1 %v3167_v54  ;;  %v3727_v53 = vor.u32 %v4727_v45, %v3726_v44  ;;  %v3854_v54 = vld [vmem:[#allocation5 + $0x568] sm:$0xf]  ;;  %v4723_v58 = vld [vmem:[#allocation5 + $0x454] sm:$0xf0]  ;;  %v4597_v26 = vld [vmem:[#allocation5 + $0x6c] sm:$0xf] }
  0xa3   :  { %v3711_v1 = vor.u32 %v4723_v58, %v3710_v57  ;;  %v3838_v2 = vld [vmem:[#allocation5 + $0x548] sm:$0xf]  ;;  %v4755_v4 = vld [vmem:[#allocation5 + $0x554] sm:$0xf0]  ;;  %v4673_v39 = vld [vmem:[#allocation5 + $0x2cc] sm:$0xf] }
  0xa4   :  { %1639 = vmatpush.bf16.msra.mxu2 %v3615_v48  ;;  %1630 = vmatmul.bf16.vlgmr.msrb.gmra.mxu0 %v5207_v34  ;;  %v3360_v48 = vld [vmem:[#allocation5 + $0x198] sm:$0xf0]  ;;  %v3839_v14 = vor.u32 %v4755_v4, %v3838_v2  ;;  %v3822_v16 = vld [vmem:[#allocation5 + $0x528] sm:$0xf]  ;;  %v4751_v18 = vld [vmem:[#allocation5 + $0x534] sm:$0xf0] }
  0xa5   :  { %1685 = vmatpush.bf16.msra.mxu0 %v3935_v63  ;;  %1602 = vmatmul.bf16.vlgmr.msrb.gmra.mxu1 %v5209_v35  ;;  %v3248_v63 = vld [vmem:[#allocation5 + $0xb8] sm:$0xf0]  ;;  %v3678_v20 = vld [vmem:[#allocation5 + $0x408] sm:$0xf]  ;;  %v3823_v29 = vor.u32 %v4751_v18, %v3822_v16  ;;  %v4747_v36 = vld [vmem:[#allocation5 + $0x514] sm:$0xf0] }
  0xa6   :  { %1650 = vmatpush.bf16.msra.mxu1 %v3791_v55  ;;  %1615 = vmatpush.bf16.msra.mxu3 %v3295_v5  ;;  %v3363_v55 = vor.u32 %v4633_v47, %v3360_v48  ;;  %v3694_v5 = vld [vmem:[#allocation5 + $0x428] sm:$0xf]  ;;  %v4617_v44 = vld [vmem:[#allocation5 + $0x10c] sm:$0xf]  ;;  %v3296_v45 = vld [vmem:[#allocation5 + $0x118] sm:$0xf0] }
  0xa7   :  { %v3806_v33 = vld [vmem:[#allocation5 + $0x508] sm:$0xf]  ;;  %v3200_v47 = vld [vmem:[#allocation5 + $0x58] sm:$0xf0]  ;;  %v4773_v51 = vld [vmem:[#allocation5 + $0x5ec] sm:$0xf] }
  0xa8   :  { %1640 = vmatpush.bf16.msra.mxu2 %v3599_v0  ;;  %v3855_v0 = vor.u32 %v4759_v56, %v3854_v54  ;;  %v3807_v48 = vor.u32 %v4747_v36, %v3806_v33  ;;  %v3299_v54 = vor.u32 %v4617_v44, %v3296_v45  ;;  %v4669_v56 = vld [vmem:[#allocation5 + $0x2ac] sm:$0xf]  ;;  %v3504_v57 = vld [vmem:[#allocation5 + $0x2b8] sm:$0xf0] }
  0xa9   :  { %1706 = vmatpush.bf16.msrb.mxu0 %v3411_v9  ;;  %1616 = vmatmul.bf16.vlgmr.msra.gmra.mxu3 %v5213_v41  ;;  %v3251_v9 = vor.u32 %v4605_v62, %v3248_v63  ;;  %v4589_v59 = vld [vmem:[#allocation5 + $0x2c] sm:$0xf]  ;;  %v3184_v60 = vld [vmem:[#allocation5 + $0x38] sm:$0xf0]  ;;  %v3507_v63 = vor.u32 %v4669_v56, %v3504_v57 }
  0xaa   :  { %1664 = vmatpush.bf16.msrb.mxu3 %v3919_v6  ;;  %1651 = vmatpush.bf16.msra.mxu1 %v3775_v7  ;;  %v4719_v6 = vld [vmem:[#allocation5 + $0x434] sm:$0xf0]  ;;  %v4625_v7 = vld [vmem:[#allocation5 + $0x14c] sm:$0xf]  ;;  %v3792_v10 = vld [vmem:[#allocation5 + $0x4f8] sm:$0xf0] }
  0xab   :  { %v3331_v19 = vor.u32 %v4625_v7, %v3328_v8  ;;  %v4701_v2 = vld [vmem:[#allocation5 + $0x3ac] sm:$0xf]  ;;  %v3168_v8 = vld [vmem:[#allocation5 + $0x18] sm:$0xf0] }
  0xac   :  { %1641 = vmatpush.bf16.msra.mxu2 %v3583_v15  ;;  %v3695_v15 = vor.u32 %v4719_v6, %v3694_v5  ;;  %v4665_v4 = vld [vmem:[#allocation5 + $0x28c] sm:$0xf]  ;;  %v3488_v5 = vld [vmem:[#allocation5 + $0x298] sm:$0xf0]  ;;  %v3187_v6 = vor.u32 %v4589_v59, %v3184_v60 }
  0xad   :  { %1707 = vmatpush.bf16.msrb.mxu0 %v3395_v24  ;;  %v4621_v24 = vld [vmem:[#allocation5 + $0x12c] sm:$0xf]  ;;  %v3888_v18 = vld [vmem:[#allocation5 + $0x5b8] sm:$0xf0] }
  0xae   :  { %1665 = vmatpush.bf16.msrb.mxu3 %v3903_v21  ;;  %1652 = vmatpush.bf16.msra.mxu1 %v3759_v22  ;;  %v4715_v21 = vld [vmem:[#allocation5 + $0x414] sm:$0xf0]  ;;  %v4677_v22 = vld [vmem:[#allocation5 + $0x2ec] sm:$0xf]  ;;  %v3315_v32 = vor.u32 %v4621_v24, %v3312_v25  ;;  %v3600_v33 = vld [vmem:[#allocation5 + $0x378] sm:$0xf0] }
  0xaf   :  { %v3679_v30 = vor.u32 %v4715_v21, %v3678_v20  ;;  %v3539_v31 = vor.u32 %v4677_v22, %v3536_v23  ;;  %v4585_v7 = vld [vmem:[#allocation5 + $0xc] sm:$0xf]  ;;  %v3616_v20 = vld [vmem:[#allocation5 + $0x398] sm:$0xf0] }
  0xb0   :  { %1642 = vmatpush.bf16.msra.mxu2 %v3567_v28  ;;  %v3216_v28 = vld [vmem:[#allocation5 + $0x78] sm:$0xf0]  ;;  %v4765_v16 = vld [vmem:[#allocation5 + $0x5ac] sm:$0xf]  ;;  %v3171_v23 = vor.u32 %v4585_v7, %v3168_v8 }
  0xb1   :  { %1708 = vmatpush.bf16.msrb.mxu0 %v3379_v42  ;;  %v3520_v42 = vld [vmem:[#allocation5 + $0x2d8] sm:$0xf0]  ;;  %v3219_v43 = vor.u32 %v4597_v26, %v3216_v28  ;;  %v4661_v21 = vld [vmem:[#allocation5 + $0x26c] sm:$0xf]  ;;  %v3891_v26 = vor.u32 %v4765_v16, %v3888_v18 }
  0xb2   :  { %1666 = vmatpush.bf16.msrb.mxu3 %v3887_v37  ;;  %1653 = vmatpush.bf16.msra.mxu1 %v3743_v38  ;;  %v4709_v37 = vld [vmem:[#allocation5 + $0x3ec] sm:$0xf]  ;;  %v3664_v38 = vld [vmem:[#allocation5 + $0x3f8] sm:$0xf0]  ;;  %v3523_v50 = vor.u32 %v4673_v39, %v3520_v42 }
  0xb3   :  { %v3472_v22 = vld [vmem:[#allocation5 + $0x278] sm:$0xf0]  ;;  %v4737_v25 = vld [vmem:[#allocation5 + $0x4cc] sm:$0xf] }
  0xb4   :  { %1643 = vmatpush.bf16.msra.mxu2 %v3551_v46  ;;  %3942 = vmatmul.msk.bf16.vlgmr.msra.gmra.mxu0 %vm1394_vm0, %v5224_v11  ;;  %v4593_v46 = vld [vmem:[#allocation5 + $0x4c] sm:$0xf]  ;;  %v3760_v39 = vld [vmem:[#allocation5 + $0x4b8] sm:$0xf0] }
  0xb5   :  { %1709 = vmatpush.bf16.msrb.mxu0 %v3363_v55  ;;  %v3648_v55 = vld [vmem:[#allocation5 + $0x3d8] sm:$0xf0]  ;;  %v3203_v58 = vor.u32 %v4593_v46, %v3200_v47  ;;  %v4657_v36 = vld [vmem:[#allocation5 + $0x24c] sm:$0xf] }
  0xb6   :  { %1667 = vmatpush.bf16.msrb.mxu3 %v3871_v52  ;;  %1654 = vmatpush.bf16.msra.mxu1 %v3727_v53  ;;  %v3920_v52 = vld [vmem:[#allocation5 + $0x5f8] sm:$0xf0]  ;;  %v4705_v53 = vld [vmem:[#allocation5 + $0x3cc] sm:$0xf] }
  0xb7   :  { %1644 = vmatmul.bf16.vlgmr.msra.gmra.mxu2 %v5211_v40  ;;  %v3651_v62 = vor.u32 %v4705_v53, %v3648_v55  ;;  %v4757_v45 = vld [vmem:[#allocation5 + $0x56c] sm:$0xf]  ;;  %v3856_v46 = vld [vmem:[#allocation5 + $0x578] sm:$0xf0] }
  0xb8   :  { %1692 = vmatpush.bf16.msrb.mxu2 %v3283_v49  ;;  %v3667_v49 = vor.u32 %v4709_v37, %v3664_v38  ;;  %v3456_v37 = vld [vmem:[#allocation5 + $0x258] sm:$0xf0]  ;;  %v4733_v38 = vld [vmem:[#allocation5 + $0x4ac] sm:$0xf] }
  0xb9   :  { %1710 = vmatpush.bf16.msrb.mxu0 %v3347_v3  ;;  %v3632_v3 = vld [vmem:[#allocation5 + $0x3b8] sm:$0xf0]  ;;  %v3459_v44 = vor.u32 %v4657_v36, %v3456_v37  ;;  %v4689_v47 = vld [vmem:[#allocation5 + $0x34c] sm:$0xf] }
  0xba   :  { %1668 = vmatpush.bf16.msrb.mxu3 %v3855_v0  ;;  %1655 = vmatpush.bf16.msra.mxu1 %v3711_v1  ;;  %v4769_v0 = vld [vmem:[#allocation5 + $0x5cc] sm:$0xf]  ;;  %v3904_v1 = vld [vmem:[#allocation5 + $0x5d8] sm:$0xf0] }
  0xbb   :  { %v3907_v13 = vor.u32 %v4769_v0, %v3904_v1  ;;  %v3744_v53 = vld [vmem:[#allocation5 + $0x498] sm:$0xf0]  ;;  %v4753_v57 = vld [vmem:[#allocation5 + $0x54c] sm:$0xf] }
  0xbc   :  { %1693 = vmatpush.bf16.msrb.mxu2 %v3267_v61  ;;  %v3923_v61 = vor.u32 %v4773_v51, %v3920_v52  ;;  %v3763_v51 = vor.u32 %v4733_v38, %v3760_v39  ;;  %v4729_v52 = vld [vmem:[#allocation5 + $0x48c] sm:$0xf]  ;;  %v3568_v60 = vld [vmem:[#allocation5 + $0x338] sm:$0xf0]  ;;  %v4838_v39 = vld [vmem:[#allocation8 + $0x1cc] sm:$0xf0] }
  0xbd   :  { %1711 = vmatpush.bf16.msrb.mxu0 %v3331_v19  ;;  %v4697_v19 = vld [vmem:[#allocation5 + $0x38c] sm:$0xf]  ;;  %v3728_v0 = vld [vmem:[#allocation5 + $0x478] sm:$0xf0] }
  0xbe   :  { %1669 = vmatpush.bf16.msrb.mxu3 %v3839_v14  ;;  %1656 = vmatpush.bf16.msra.mxu1 %v3695_v15  ;;  %v3635_v14 = vor.u32 %v4701_v2, %v3632_v3  ;;  %v3491_v15 = vor.u32 %v4665_v4, %v3488_v5  ;;  %v3619_v28 = vor.u32 %v4697_v19, %v3616_v20  ;;  %v4685_v59 = vld [vmem:[#allocation5 + $0x32c] sm:$0xf]  ;;  %v3824_v5 = vld [vmem:[#allocation5 + $0x538] sm:$0xf0] }
  0xbf   :  { %v4749_v2 = vld [vmem:[#allocation5 + $0x52c] sm:$0xf]  ;;  %v3571_v3 = vor.u32 %v4685_v59, %v3568_v60  ;;  %v3936_v7 = vld [vmem:[#allocation5 + $0x618] sm:$0xf0]  ;;  %v4830_v59 = vld [vmem:[#allocation8 + $0x18c] sm:$0xf0] }
  0xc0   :  { %1694 = vmatpush.bf16.msrb.mxu2 %v3251_v9  ;;  %v4741_v9 = vld [vmem:[#allocation5 + $0x4ec] sm:$0xf]  ;;  %v3827_v16 = vor.u32 %v4749_v2, %v3824_v5  ;;  %v3712_v19 = vld [vmem:[#allocation5 + $0x458] sm:$0xf0]  ;;  %v4122_v2 = vld [vmem:[#allocation8 + $0x160] sm:$0xf] }
  0xc1   :  { %1712 = vmatpush.bf16.msrb.mxu0 %v3315_v32  ;;  %v3795_v24 = vor.u32 %v4741_v9, %v3792_v10  ;;  %v4693_v32 = vld [vmem:[#allocation5 + $0x36c] sm:$0xf]  ;;  %v3552_v9 = vld [vmem:[#allocation5 + $0x318] sm:$0xf0] }
  0xc2   :  { %1670 = vmatpush.bf16.msrb.mxu3 %v3823_v29  ;;  %1657 = vmatpush.bf16.msra.mxu1 %v3679_v30  ;;  %v3475_v29 = vor.u32 %v4661_v21, %v3472_v22  ;;  %v4761_v30 = vld [vmem:[#allocation5 + $0x58c] sm:$0xf]  ;;  %v4186_v21 = vld [vmem:[#allocation8 + $0x1e0] sm:$0xf]  ;;  %v3696_v36 = vld [vmem:[#allocation5 + $0x438] sm:$0xf0] }
  0xc3   :  { %v4681_v8 = vld [vmem:[#allocation5 + $0x30c] sm:$0xf] }
  0xc4   :  { %1695 = vmatpush.bf16.msrb.mxu2 %v3235_v27  ;;  %v3776_v27 = vld [vmem:[#allocation5 + $0x4d8] sm:$0xf0]  ;;  %v4721_v18 = vld [vmem:[#allocation5 + $0x44c] sm:$0xf]  ;;  %v3555_v20 = vor.u32 %v4681_v8, %v3552_v9 }
  0xc5   :  { %1658 = vmatmul.bf16.vlgmr.msra.gmra.mxu1 %v5227_v12  ;;  %1713 = vmatpush.bf16.msrb.mxu0 %v3299_v54  ;;  %v3859_v54 = vor.u32 %v4757_v45, %v3856_v46 }
  0xc6   :  { %1720 = vmatpush.bf16.msrb.mxu1 %v3539_v31  ;;  %1671 = vmatpush.bf16.msrb.mxu3 %v3807_v48  ;;  %v3872_v31 = vld [vmem:[#allocation5 + $0x598] sm:$0xf0] }
  0xc7   :  { %v3875_v42 = vor.u32 %v4761_v30, %v3872_v31  ;;  %v3584_v48 = vld [vmem:[#allocation5 + $0x358] sm:$0xf0]  ;;  %v5253_v30 = vld [vmem:[#allocation7] sm:$0xf] }
  0xc8   :  { %1696 = vmatpush.bf16.msrb.mxu2 %v3219_v43  ;;  %1714 = vmatmul.bf16.vlgmr.msrb.gmra.mxu0 %v5213_v41  ;;  %v3779_v41 = vor.u32 %v4737_v25, %v3776_v27  ;;  %v3603_v43 = vor.u32 %v4693_v32, %v3600_v33  ;;  %v3587_v55 = vor.u32 %v4689_v47, %v3584_v48  ;;  %v4842_v25 = vld [vmem:[#allocation8 + $0x1ec] sm:$0xf0]  ;;  %v4717_v33 = vld [vmem:[#allocation5 + $0x42c] sm:$0xf]  ;;  %v406_v45 = vperm.slane %v5253_v30, 0 }
  0xc9   :  { %1672 = vmatmul.bf16.vlgmr.msrb.gmra.mxu3 %v5230_v17  ;;  %1762 = vmatpush.bf16.msra.mxu0 %v3923_v61  ;;  %v4649_v61 = vld [vmem:[#allocation5 + $0x20c] sm:$0xf]  ;;  %v3715_v32 = vor.u32 %v4721_v18, %v3712_v19  ;;  %v3699_v46 = vor.u32 %v4717_v33, %v3696_v36  ;;  %v3962_v18 = vld [vmem:[#allocation8 + $0x20] sm:$0xf]  ;;  %v4814_v33 = vld [vmem:[#allocation8 + $0x10c] sm:$0xf0] }
  0xca   :  { %1734 = vmatpush.bf16.msra.mxu3 %v3667_v49  ;;  %1721 = vmatpush.bf16.msrb.mxu1 %v3523_v50  ;;  %v4653_v49 = vld [vmem:[#allocation5 + $0x22c] sm:$0xf]  ;;  %v3440_v50 = vld [vmem:[#allocation5 + $0x238] sm:$0xf0] }
  0xcb   :  { %v3443_v56 = vor.u32 %v4653_v49, %v3440_v50  ;;  %v4713_v48 = vld [vmem:[#allocation5 + $0x40c] sm:$0xf]  ;;  %v3680_v49 = vld [vmem:[#allocation5 + $0x418] sm:$0xf0] }
  0xcc   :  { %1697 = vmatpush.bf16.msrb.mxu2 %v3203_v58  ;;  %v3840_v58 = vld [vmem:[#allocation5 + $0x558] sm:$0xf0] }
  0xcd   :  { %1763 = vmatpush.bf16.msra.mxu0 %v3907_v13  ;;  %v3843_v1 = vor.u32 %v4753_v57, %v3840_v58  ;;  %v4058_v13 = vld [vmem:[#allocation8 + $0xe0] sm:$0xf] }
  0xce   :  { %1735 = vmatpush.bf16.msra.mxu3 %v3651_v62  ;;  %1722 = vmatpush.bf16.msrb.mxu1 %v3507_v63  ;;  %v3424_v62 = vld [vmem:[#allocation5 + $0x218] sm:$0xf0]  ;;  %v4725_v63 = vld [vmem:[#allocation5 + $0x46c] sm:$0xf]  ;;  %v4138_v57 = vld [vmem:[#allocation8 + $0x180] sm:$0xf] }
  0xcf   :  { %v3427_v4 = vor.u32 %v4649_v61, %v3424_v62  ;;  %v4139_v62 = vor.u32 %v4830_v59, %v4138_v57  ;;  %v4800_v57 = vld [vmem:[#allocation8 + $0xa4] sm:$0xf]  ;;  %v4028_v59 = vld [vmem:[#allocation8 + $0xb0] sm:$0xf0] }
  0xd0   :  { %1698 = vmatpush.bf16.msrb.mxu2 %v3187_v6  ;;  %v4777_v6 = vld [vmem:[#allocation5 + $0x60c] sm:$0xf] }
  0xd1   :  { %1764 = vmatpush.bf16.msra.mxu0 %v3891_v26  ;;  %v3939_v10 = vor.u32 %v4777_v6, %v3936_v7  ;;  %v4042_v26 = vld [vmem:[#allocation8 + $0xc0] sm:$0xf]  ;;  %v4790_v7 = vld [vmem:[#allocation8 + $0x4c] sm:$0xf0] }
  0xd2   :  { %1736 = vmatpush.bf16.msra.mxu3 %v3635_v14  ;;  %1723 = vmatpush.bf16.msrb.mxu1 %v3491_v15  ;;  %v4810_v14 = vld [vmem:[#allocation8 + $0xec] sm:$0xf0]  ;;  %v3731_v15 = vor.u32 %v4725_v63, %v3728_v0  ;;  %v3978_v6 = vld [vmem:[#allocation8 + $0x40] sm:$0xf] }
  0xd3   :  { %v4059_v22 = vor.u32 %v4810_v14, %v4058_v13  ;;  %v4794_v63 = vld [vmem:[#allocation8 + $0x6c] sm:$0xf0] }
  0xd4   :  { %1699 = vmatpush.bf16.msrb.mxu2 %v3171_v23  ;;  %v4745_v23 = vld [vmem:[#allocation5 + $0x50c] sm:$0xf]  ;;  %v1407_v27 = vpop.f32.mrf.mxu0  ;;  %v4822_v13 = vld [vmem:[#allocation8 + $0x14c] sm:$0xf0] }
  0xd5   :  { %1765 = vmatpush.bf16.msra.mxu0 %v3875_v42  ;;  %v4026_v42 = vld [vmem:[#allocation8 + $0xa0] sm:$0xf] }
  0xd6   :  { %1737 = vmatpush.bf16.msra.mxu3 %v3619_v28  ;;  %1724 = vmatpush.bf16.msrb.mxu1 %v3475_v29  ;;  %v4806_v28 = vld [vmem:[#allocation8 + $0xcc] sm:$0xf0]  ;;  %v4187_v29 = vor.u32 %v4842_v25, %v4186_v21  ;;  %v1421_v31 = vpop.f32.mrf.mxu1 }
  0xd7   :  { %1700 = vmatmul.bf16.vlgmr.msrb.gmra.mxu2 %v5209_v35  ;;  %v3747_v35 = vor.u32 %v4729_v52, %v3744_v53  ;;  %v4043_v38 = vor.u32 %v4806_v28, %v4042_v26  ;;  %v4010_v52 = vld [vmem:[#allocation8 + $0x80] sm:$0xf]  ;;  %v4798_v53 = vld [vmem:[#allocation8 + $0x8c] sm:$0xf0] }
  0xd8   :  { %1748 = vmatpush.bf16.msra.mxu2 %v3795_v24  ;;  %v3808_v24 = vld [vmem:[#allocation5 + $0x518] sm:$0xf0]  ;;  %v4011_v61 = vor.u32 %v4798_v53, %v4010_v52  ;;  %v4786_v21 = vld [vmem:[#allocation8 + $0x2c] sm:$0xf0]  ;;  %v3946_v26 = vld [vmem:[#allocation8] sm:$0xf] }
  0xd9   :  { %1766 = vmatpush.bf16.msra.mxu0 %v3859_v54  ;;  %v3811_v37 = vor.u32 %v4745_v23, %v3808_v24  ;;  %v4782_v28 = vld [vmem:[#allocation8 + $0xc] sm:$0xf0]  ;;  %v4836_v52 = vld [vmem:[#allocation8 + $0x1c4] sm:$0xf]  ;;  %v4172_v53 = vld [vmem:[#allocation8 + $0x1d0] sm:$0xf0] }
  0xda   :  { %1738 = vmatpush.bf16.msra.mxu3 %v3603_v43  ;;  %1725 = vmatpush.bf16.msrb.mxu1 %v3459_v44  ;;  %v4802_v43 = vld [vmem:[#allocation8 + $0xac] sm:$0xf0]  ;;  %v1435_v47 = vpop.f32.mrf.mxu2 }
  0xdb   :  { %v4027_v50 = vor.u32 %v4802_v43, %v4026_v42  ;;  %v1449_v58 = vpop.f32.mrf.mxu3  ;;  %v3947_v42 = vor.u32 %v4782_v28, %v3946_v26  ;;  %v4282_v26 = vld [vmem:[#allocation8 + $0x2a0] sm:$0xf]  ;;  %v4866_v28 = vld [vmem:[#allocation8 + $0x2ac] sm:$0xf0] }
  0xdc   :  { %1749 = vmatpush.bf16.msra.mxu2 %v3779_v41  ;;  %v4170_v41 = vld [vmem:[#allocation8 + $0x1c0] sm:$0xf] }
  0xdd   :  { %1767 = vmatpush.bf16.msra.mxu0 %v3843_v1  ;;  %v4171_v44 = vor.u32 %v4838_v39, %v4170_v41  ;;  %v4840_v41 = vld [vmem:[#allocation8 + $0x1e4] sm:$0xf] }
  0xde   :  { %1739 = vmatpush.bf16.msra.mxu3 %v3587_v55  ;;  %1726 = vmatpush.bf16.msrb.mxu1 %v3443_v56  ;;  %v1408_v55 = vadd.f32 %v1407_v27, %v406_v45  ;;  %v3683_v56 = vor.u32 %v4713_v48, %v3680_v49  ;;  %v1423_v60 = vpop.f32.mrf.mxu1  ;;  %v3963_v27 = vor.u32 %v4786_v21, %v3962_v18 }
  0xe0   :  { %1750 = vmatpush.bf16.msra.mxu2 %v3763_v51  ;;  %v4834_v51 = vld [vmem:[#allocation8 + $0x1ac] sm:$0xf0]  ;;  %v1422_v0 = vadd.f32 %v1421_v31, %v1408_v55  ;;  %v4808_v31 = vld [vmem:[#allocation8 + $0xe4] sm:$0xf] }
  0xe1   :  { %1768 = vmatpush.bf16.msra.mxu0 %v3827_v16  ;;  %v3979_v16 = vor.u32 %v4790_v7, %v3978_v6  ;;  %v4792_v7 = vld [vmem:[#allocation8 + $0x64] sm:$0xf] }
  0xe2   :  { %1740 = vmatpush.bf16.msra.mxu3 %v3571_v3  ;;  %1727 = vmatpush.bf16.msrb.mxu1 %v3427_v4  ;;  %v4826_v3 = vld [vmem:[#allocation8 + $0x16c] sm:$0xf0]  ;;  %v1437_v5 = vpop.f32.mrf.mxu2  ;;  %v1436_v8 = vadd.f32 %v1435_v47, %v1422_v0 }
  0xe4   :  { %1751 = vmatpush.bf16.msra.mxu2 %v3747_v35  ;;  %v3994_v35 = vld [vmem:[#allocation8 + $0x60] sm:$0xf]  ;;  %v1450_v23 = vadd.f32 %v1449_v58, %v1436_v8  ;;  %v4175_v58 = vor.u32 %v4836_v52, %v4172_v53  ;;  %v3948_v52 = vld [vmem:[#allocation8 + $0x10] sm:$0xf0]  ;;  %v4812_v53 = vld [vmem:[#allocation8 + $0x104] sm:$0xf] }
  0xe5   :  { %1728 = vmatmul.bf16.vlgmr.msrb.gmra.mxu1 %v5207_v34  ;;  %1769 = vmatpush.bf16.msra.mxu0 %v3811_v37  ;;  %v4154_v34 = vld [vmem:[#allocation8 + $0x1a0] sm:$0xf]  ;;  %v3995_v4 = vor.u32 %v4794_v63, %v3994_v35  ;;  %v4060_v37 = vld [vmem:[#allocation8 + $0xf0] sm:$0xf0]  ;;  %v4031_v63 = vor.u32 %v4800_v57, %v4028_v59  ;;  %v4811_v57 = vld [vmem:[#allocation8 + $0xf4] sm:$0xf0] }
  0xe6   :  { %1783 = vmatpush.bf16.msra.mxu1 %v3939_v10  ;;  %1741 = vmatpush.bf16.msra.mxu3 %v3555_v20  ;;  %v4155_v54 = vor.u32 %v4834_v51, %v4154_v34  ;;  %v4106_v10 = vld [vmem:[#allocation8 + $0x140] sm:$0xf]  ;;  %v1451_v20 = vpop.f32.mrf.mxu3  ;;  %v4063_v48 = vor.u32 %v4808_v31, %v4060_v37  ;;  %v4044_v51 = vld [vmem:[#allocation8 + $0xd0] sm:$0xf0]  ;;  %v407_v31 = vperm.slane %v5253_v30, 1 }
  0xe7   :  { %v4107_v19 = vor.u32 %v4822_v13, %v4106_v10  ;;  %v4874_v10 = vld [vmem:[#allocation8 + $0x2ec] sm:$0xf0]  ;;  %v3996_v13 = vld [vmem:[#allocation8 + $0x70] sm:$0xf0] }
  0xe8   :  { %1752 = vmatpush.bf16.msra.mxu2 %v3731_v15  ;;  %1770 = vmatmul.bf16.vlgmr.msra.gmra.mxu0 %v5230_v17  ;;  %v4123_v17 = vor.u32 %v4826_v3, %v4122_v2  ;;  %v4796_v2 = vld [vmem:[#allocation8 + $0x84] sm:$0xf]  ;;  %v4012_v3 = vld [vmem:[#allocation8 + $0x90] sm:$0xf0]  ;;  %v3999_v21 = vor.u32 %v4792_v7, %v3996_v13  ;;  %v4854_v7 = vld [vmem:[#allocation8 + $0x24c] sm:$0xf0] }
  0xe9   :  { %1742 = vmatmul.bf16.vlgmr.msra.gmra.mxu3 %v5211_v40  ;;  %v1409_v40 = vpop.f32.mrf.mxu0  ;;  %v4015_v6 = vor.u32 %v4796_v2, %v4012_v3  ;;  %v4858_v2 = vld [vmem:[#allocation8 + $0x26c] sm:$0xf0] }
  0xea   :  { %2580 = vmatpush.bf16.msrb.mxu3 %v4059_v22  ;;  %2594 = vmatpush.bf16.msrb.mxu1 %v4187_v29  ;;  %v1410_v1 = vadd.f32 %v1409_v40, %v406_v45  ;;  %v4090_v22 = vld [vmem:[#allocation8 + $0x120] sm:$0xf] }
  0xec   :  { %1753 = vmatpush.bf16.msra.mxu2 %v3715_v32  ;;  %v1424_v9 = vadd.f32 %v1423_v60, %v1410_v1  ;;  %v4074_v32 = vld [vmem:[#allocation8 + $0x100] sm:$0xf]  ;;  %v4832_v60 = vld [vmem:[#allocation8 + $0x1a4] sm:$0xf] }
  0xed   :  { %v1477_v15 = vpop.f32.mrf.mxu1 }
  0xee   :  { %2581 = vmatpush.bf16.msrb.mxu3 %v4043_v38  ;;  %2595 = vmatpush.bf16.msrb.mxu1 %v4171_v44  ;;  %v1438_v24 = vadd.f32 %v1437_v5, %v1424_v9  ;;  %v4188_v38 = vld [vmem:[#allocation8 + $0x1f0] sm:$0xf0]  ;;  %v5262_v47 = vpop.f32.mrf.mxu3  ;;  %v4314_v9 = vld [vmem:[#allocation8 + $0x2e0] sm:$0xf] }
  0xef   :  { %v4191_v49 = vor.u32 %v4840_v41, %v4188_v38  ;;  %v4140_v5 = vld [vmem:[#allocation8 + $0x190] sm:$0xf0]  ;;  %v4266_v41 = vld [vmem:[#allocation8 + $0x280] sm:$0xf]  ;;  %v4862_v38 = vld [vmem:[#allocation8 + $0x28c] sm:$0xf0] }
  0xf0   :  { %1754 = vmatpush.bf16.msra.mxu2 %v3699_v46  ;;  %v1452_v36 = vadd.f32 %v1451_v20, %v1438_v24  ;;  %v4075_v46 = vor.u32 %v4814_v33, %v4074_v32  ;;  %v4870_v20 = vld [vmem:[#allocation8 + $0x2cc] sm:$0xf0]  ;;  %v4820_v24 = vld [vmem:[#allocation8 + $0x144] sm:$0xf]  ;;  %v4283_v32 = vor.u32 %v4866_v28, %v4282_v26  ;;  %v4202_v28 = vld [vmem:[#allocation8 + $0x200] sm:$0xf] }
  0xf1   :  { %v1463_v14 = vpop.f32.mrf.mxu0 }
  0xf2   :  { %2582 = vmatpush.bf16.msrb.mxu3 %v4027_v50  ;;  %2596 = vmatpush.bf16.msrb.mxu1 %v4155_v54  ;;  %v1464_v25 = vadd.f32 %v1463_v14, %v1450_v23  ;;  %v4804_v50 = vld [vmem:[#allocation8 + $0xc4] sm:$0xf] }
  0xf3   :  { %v4824_v14 = vld [vmem:[#allocation8 + $0x164] sm:$0xf] }
  0xf4   :  { %1755 = vmatpush.bf16.msra.mxu2 %v3683_v56  ;;  %v1478_v43 = vadd.f32 %v1477_v15, %v1464_v25  ;;  %v4047_v56 = vor.u32 %v4804_v50, %v4044_v51  ;;  %v4124_v15 = vld [vmem:[#allocation8 + $0x170] sm:$0xf0] }
  0xf5   :  { %3943 = vmatmul.msk.bf16.vlgmr.msra.gmra.mxu1 %vm1394_vm0, %v5224_v11  ;;  %v1491_v11 = vpop.f32.mrf.mxu2  ;;  %v1479_v45 = vpop.f32.mrf.mxu1  ;;  %v4127_v23 = vor.u32 %v4824_v14, %v4124_v15  ;;  %v4034_v14 = vld [vmem:[#allocation8 + $0xa8] sm:$0xf]  ;;  %v4803_v15 = vld [vmem:[#allocation8 + $0xb4] sm:$0xf0] }
  0xf6   :  { %2583 = vmatpush.bf16.msrb.mxu3 %v4011_v61  ;;  %2597 = vmatpush.bf16.msrb.mxu1 %v4139_v62  ;;  %v1492_v54 = vadd.f32 %v1491_v11, %v1478_v43  ;;  %v4156_v61 = vld [vmem:[#allocation8 + $0x1b0] sm:$0xf0] }
  0xf7   :  { %1756 = vmatmul.bf16.vlgmr.msra.gmra.mxu2 %v5227_v12  ;;  %v4818_v12 = vld [vmem:[#allocation8 + $0x12c] sm:$0xf0]  ;;  %v4159_v0 = vor.u32 %v4832_v60, %v4156_v61  ;;  %v4092_v43 = vld [vmem:[#allocation8 + $0x130] sm:$0xf0] }
  0xf8   :  { %v4091_v29 = vor.u32 %v4818_v12, %v4090_v22  ;;  %v1790_v62 = vmax.f32 %v1492_v54, 0.0  ;;  %v4788_v22 = vld [vmem:[#allocation8 + $0x44] sm:$0xf]  ;;  %v3980_v12 = vld [vmem:[#allocation8 + $0x50] sm:$0xf0] }
  0xf9   :  { %v1465_v39 = vpop.f32.mrf.mxu0  ;;  %v3983_v33 = vor.u32 %v4788_v22, %v3980_v12  ;;  %v4076_v54 = vld [vmem:[#allocation8 + $0x110] sm:$0xf0]  ;;  %v4799_v22 = vld [vmem:[#allocation8 + $0x94] sm:$0xf0]  ;;  %v4218_v12 = vld [vmem:[#allocation8 + $0x220] sm:$0xf] }
  0xfa   :  { %2584 = vmatpush.bf16.msrb.mxu3 %v3995_v4  ;;  %2598 = vmatpush.bf16.msrb.mxu1 %v4123_v17  ;;  %v1466_v44 = vadd.f32 %v1465_v39, %v1452_v36  ;;  %v4828_v4 = vld [vmem:[#allocation8 + $0x184] sm:$0xf]  ;;  %v1507_v17 = vpop.f32.mrf.mxu3  ;;  %v3964_v39 = vld [vmem:[#allocation8 + $0x30] sm:$0xf0]  ;;  %v4079_v59 = vor.u32 %v4812_v53, %v4076_v54  ;;  %v4791_v53 = vld [vmem:[#allocation8 + $0x54] sm:$0xf0] }
  0xfb   :  { %v4143_v8 = vor.u32 %v4828_v4, %v4140_v5  ;;  %v4784_v36 = vld [vmem:[#allocation8 + $0x24] sm:$0xf]  ;;  %v1508_v51 = vadd.f32 %v1507_v17, %v407_v31 }
  0xfc   :  { %v1480_v34 = vadd.f32 %v1479_v45, %v1466_v44  ;;  %v1506_v45 = vadd.f32 %v5262_v47, %v407_v31 }
  0xfd   :  { %v1493_v55 = vpop.f32.mrf.mxu2 }
  0xfe   :  { %2585 = vmatpush.bf16.msrb.mxu3 %v3979_v16  ;;  %2599 = vmatpush.bf16.msrb.mxu1 %v4107_v19  ;;  %v1494_v40 = vadd.f32 %v1493_v55, %v1480_v34  ;;  %v4315_v16 = vor.u32 %v4874_v10, %v4314_v9  ;;  %v4298_v19 = vld [vmem:[#allocation8 + $0x2c0] sm:$0xf]  ;;  %v4780_v34 = vld [vmem:[#allocation8 + $0x4] sm:$0xf] }
  0xff   :  { %v4299_v25 = vor.u32 %v4870_v20, %v4298_v19  ;;  %v3951_v47 = vor.u32 %v4780_v34, %v3948_v52  ;;  %v4035_v20 = vor.u32 %v4803_v15, %v4034_v14  ;;  %v3986_v52 = vld [vmem:[#allocation8 + $0x48] sm:$0xf] }
 0x100   :  { %v1794_v35 = vmax.f32 %v1494_v40, 0.0  ;;  %2608 = vmatpush.bf16.msrb.mxu2 %v4315_v16  ;;  %v4146_v15 = vld [vmem:[#allocation8 + $0x188] sm:$0xf] }
 0x102   :  { %2586 = vmatpush.bf16.msrb.mxu3 %v3963_v27  ;;  %2600 = vmatpush.bf16.msrb.mxu1 %v4091_v29  ;;  %v5264_v1 = vpack.c.bf16 %v1794_v35, %v1790_v62  ;;  %v4108_v27 = vld [vmem:[#allocation8 + $0x150] sm:$0xf0]  ;;  %v1533_v29 = vpop.f32.mrf.mxu0  ;;  %v4050_v35 = vld [vmem:[#allocation8 + $0xc8] sm:$0xf] }
 0x103   :  { %v4111_v37 = vor.u32 %v4820_v24, %v4108_v27 }
 0x104   :  { %2609 = vmatpush.bf16.msrb.mxu2 %v4299_v25  ;;  %v1547_v44 = vpop.f32.mrf.mxu1 }
 0x105   :  { %v1519_v18 = vpop.f32.mrf.mxu2 }
 0x106   :  { %2587 = vmatpush.bf16.msrb.mxu3 %v3947_v42  ;;  %2601 = vmatpush.bf16.msrb.mxu1 %v4075_v46  ;;  %v4816_v42 = vld [vmem:[#allocation8 + $0x124] sm:$0xf]  ;;  %v4267_v46 = vor.u32 %v4862_v38, %v4266_v41  ;;  %v4002_v41 = vld [vmem:[#allocation8 + $0x68] sm:$0xf]  ;;  %v4795_v38 = vld [vmem:[#allocation8 + $0x74] sm:$0xf0] }
 0x107   :  { %v4095_v50 = vor.u32 %v4816_v42, %v4092_v43 }
 0x108   :  { %v1561_v11 = vpop.f32.mrf.mxu3  ;;  %2610 = vmatpush.bf16.msrb.mxu2 %v4283_v32 }
 0x109   :  { %2588 = vmatmul.bf16.vlgmr.msrb.gmra.mxu3 %v5264_v1 }
 0x10a   :  { %2636 = vmatpush.bf16.msra.mxu3 %v4063_v48  ;;  %2650 = vmatpush.bf16.msra.mxu1 %v4191_v49  ;;  %v3967_v49 = vor.u32 %v4784_v36, %v3964_v39  ;;  %v1535_v40 = vpop.f32.mrf.mxu0  ;;  %v4316_v36 = vld [vmem:[#allocation8 + $0x2f0] sm:$0xf0]  ;;  %v4194_v39 = vld [vmem:[#allocation8 + $0x1e8] sm:$0xf] }
 0x10c   :  { %2611 = vmatpush.bf16.msrb.mxu2 %v4267_v46  ;;  %v1549_v5 = vpop.f32.mrf.mxu1  ;;  %v4300_v46 = vld [vmem:[#allocation8 + $0x2d0] sm:$0xf0] }
 0x10d   :  { %v1521_v48 = vpop.f32.mrf.mxu2 }
 0x10e   :  { %2637 = vmatpush.bf16.msra.mxu3 %v4047_v56  ;;  %2651 = vmatpush.bf16.msra.mxu1 %v4175_v58  ;;  %v4066_v56 = vld [vmem:[#allocation8 + $0xe8] sm:$0xf]  ;;  %v1520_v58 = vadd.f32 %v1519_v18, %v1506_v45  ;;  %v1522_v60 = vadd.f32 %v1521_v48, %v1508_v51  ;;  %v4868_v45 = vld [vmem:[#allocation8 + $0x2c4] sm:$0xf]  ;;  %v4442_v48 = vld [vmem:[#allocation8 + $0x3e0] sm:$0xf]  ;;  %v4003_v51 = vor.u32 %v4795_v38, %v4002_v41 }
 0x10f   :  { %v4067_v62 = vor.u32 %v4811_v57, %v4066_v56  ;;  %v4178_v56 = vld [vmem:[#allocation8 + $0x1c8] sm:$0xf]  ;;  %v4839_v57 = vld [vmem:[#allocation8 + $0x1d4] sm:$0xf0] }
 0x110   :  { %v1563_v55 = vpop.f32.mrf.mxu3  ;;  %v1534_v61 = vadd.f32 %v1533_v29, %v1520_v58  ;;  %v1536_v3 = vadd.f32 %v1535_v40, %v1522_v60  ;;  %v4846_v29 = vld [vmem:[#allocation8 + $0x20c] sm:$0xf0]  ;;  %v4303_v58 = vor.u32 %v4868_v45, %v4300_v46  ;;  %v4864_v40 = vld [vmem:[#allocation8 + $0x2a4] sm:$0xf]  ;;  %v4426_v60 = vld [vmem:[#allocation8 + $0x3c0] sm:$0xf] }
 0x111   :  { %v4114_v38 = vld [vmem:[#allocation8 + $0x148] sm:$0xf]  ;;  %v4852_v45 = vld [vmem:[#allocation8 + $0x244] sm:$0xf]  ;;  %v4236_v46 = vld [vmem:[#allocation8 + $0x250] sm:$0xf0] }
 0x112   :  { %2638 = vmatpush.bf16.msra.mxu3 %v4031_v63  ;;  %2652 = vmatpush.bf16.msra.mxu1 %v4159_v0  ;;  %v4807_v63 = vld [vmem:[#allocation8 + $0xd4] sm:$0xf0]  ;;  %v4250_v0 = vld [vmem:[#allocation8 + $0x260] sm:$0xf]  ;;  %v1550_v18 = vadd.f32 %v1549_v5, %v1536_v3  ;;  %v4860_v5 = vld [vmem:[#allocation8 + $0x284] sm:$0xf] }
 0x113   :  { %v4251_v4 = vor.u32 %v4858_v2, %v4250_v0  ;;  %v4051_v9 = vor.u32 %v4807_v63, %v4050_v35  ;;  %v3987_v35 = vor.u32 %v4791_v53, %v3986_v52  ;;  %v4179_v63 = vor.u32 %v4839_v57, %v4178_v56  ;;  %v3970_v0 = vld [vmem:[#allocation8 + $0x28] sm:$0xf]  ;;  %v4787_v2 = vld [vmem:[#allocation8 + $0x34] sm:$0xf0]  ;;  %v4362_v56 = vld [vmem:[#allocation8 + $0x340] sm:$0xf] }
 0x114   :  { %v1564_v19 = vadd.f32 %v1563_v55, %v1550_v18  ;;  %v4809_v18 = vld [vmem:[#allocation8 + $0xec] sm:$0xf] }
 0x115   :  { %2612 = vmatpush.bf16.msrb.mxu2 %v4251_v4  ;;  %v4162_v4 = vld [vmem:[#allocation8 + $0x1a8] sm:$0xf] }
 0x116   :  { %2639 = vmatpush.bf16.msra.mxu3 %v4015_v6  ;;  %2653 = vmatpush.bf16.msra.mxu1 %v4143_v8  ;;  %v4234_v6 = vld [vmem:[#allocation8 + $0x240] sm:$0xf]  ;;  %v1548_v8 = vadd.f32 %v1547_v44, %v1534_v61  ;;  %v4843_v44 = vld [vmem:[#allocation8 + $0x1f4] sm:$0xf0]  ;;  %v4902_v61 = vld [vmem:[#allocation8 + $0x3cc] sm:$0xf0] }
 0x117   :  { %v4235_v10 = vor.u32 %v4854_v7, %v4234_v6  ;;  %v4195_v55 = vor.u32 %v4843_v44, %v4194_v39  ;;  %v4268_v6 = vld [vmem:[#allocation8 + $0x290] sm:$0xf0]  ;;  %v4410_v7 = vld [vmem:[#allocation8 + $0x3a0] sm:$0xf]  ;;  %v4823_v39 = vld [vmem:[#allocation8 + $0x154] sm:$0xf0] }
 0x118   :  { %v1589_v13 = vpop.f32.mrf.mxu3  ;;  %v1562_v16 = vadd.f32 %v1561_v11, %v1548_v8  ;;  %v4203_v11 = vor.u32 %v4846_v29, %v4202_v28  ;;  %v3971_v8 = vor.u32 %v4787_v2, %v3970_v0  ;;  %v4801_v44 = vld [vmem:[#allocation8 + $0xac] sm:$0xf]  ;;  %v4115_v57 = vor.u32 %v4823_v39, %v4114_v38  ;;  %v4844_v0 = vld [vmem:[#allocation8 + $0x204] sm:$0xf]  ;;  %v4180_v38 = vld [vmem:[#allocation8 + $0x1d8] sm:$0xf0] }
 0x119   :  { %2613 = vmatpush.bf16.msrb.mxu2 %v4235_v10  ;;  %v4783_v10 = vld [vmem:[#allocation8 + $0x14] sm:$0xf0] }
 0x11a   :  { %2640 = vmatpush.bf16.msra.mxu3 %v3999_v21  ;;  %2654 = vmatpush.bf16.msra.mxu1 %v4127_v23  ;;  %v1575_v17 = vpop.f32.mrf.mxu2  ;;  %v4018_v21 = vld [vmem:[#allocation8 + $0x88] sm:$0xf]  ;;  %v4850_v23 = vld [vmem:[#allocation8 + $0x22c] sm:$0xf0] }
 0x11b   :  { %v1576_v24 = vadd.f32 %v1575_v17, %v1562_v16  ;;  %v4219_v25 = vor.u32 %v4850_v23, %v4218_v12  ;;  %v4019_v26 = vor.u32 %v4799_v22, %v4018_v21  ;;  %v4835_v17 = vld [vmem:[#allocation8 + $0x1b4] sm:$0xf0]  ;;  %v4068_v22 = vld [vmem:[#allocation8 + $0xf8] sm:$0xf0]  ;;  %v4394_v12 = vld [vmem:[#allocation8 + $0x380] sm:$0xf] }
 0x11c   :  { %v4163_v14 = vor.u32 %v4835_v17, %v4162_v4  ;;  %v4831_v16 = vld [vmem:[#allocation8 + $0x194] sm:$0xf0]  ;;  %v4894_v23 = vld [vmem:[#allocation8 + $0x38c] sm:$0xf0]  ;;  %v4071_v29 = vor.u32 %v4809_v18, %v4068_v22  ;;  %v4346_v4 = vld [vmem:[#allocation8 + $0x320] sm:$0xf] }
 0x11d   :  { %v1590_v32 = vadd.f32 %v1589_v13, %v1576_v24  ;;  %2614 = vmatpush.bf16.msrb.mxu2 %v4219_v25  ;;  %v4898_v13 = vld [vmem:[#allocation8 + $0x3ac] sm:$0xf0]  ;;  %v4856_v24 = vld [vmem:[#allocation8 + $0x264] sm:$0xf]  ;;  %v4252_v25 = vld [vmem:[#allocation8 + $0x270] sm:$0xf0]  ;;  %v4147_v28 = vor.u32 %v4831_v16, %v4146_v15 }
 0x11e   :  { %2641 = vmatpush.bf16.msra.mxu3 %v3983_v33  ;;  %2655 = vmatpush.bf16.msra.mxu1 %v4111_v37  ;;  %v4872_v33 = vld [vmem:[#allocation8 + $0x2e4] sm:$0xf]  ;;  %v4882_v17 = vld [vmem:[#allocation8 + $0x32c] sm:$0xf0]  ;;  %v4004_v15 = vld [vmem:[#allocation8 + $0x78] sm:$0xf0] }
 0x11f   :  { %v4319_v42 = vor.u32 %v4872_v33, %v4316_v36  ;;  %v1791_v34 = vmax.f32 %v1590_v32, 0.0  ;;  %v4827_v32 = vld [vmem:[#allocation8 + $0x174] sm:$0xf0]  ;;  %v4052_v33 = vld [vmem:[#allocation8 + $0xd8] sm:$0xf0]  ;;  %v4255_v36 = vor.u32 %v4856_v24, %v4252_v25 }
 0x120   :  { %v1591_v37 = vpop.f32.mrf.mxu3  ;;  %v4841_v16 = vld [vmem:[#allocation8 + $0x1ec] sm:$0xf]  ;;  %v4196_v22 = vld [vmem:[#allocation8 + $0x1f8] sm:$0xf0]  ;;  %v4904_v25 = vld [vmem:[#allocation8 + $0x3e4] sm:$0xf] }
 0x121   :  { %2615 = vmatpush.bf16.msrb.mxu2 %v4203_v11  ;;  %v4805_v11 = vld [vmem:[#allocation8 + $0xcc] sm:$0xf] }
 0x122   :  { %2642 = vmatpush.bf16.msra.mxu3 %v3967_v49  ;;  %2656 = vmatpush.bf16.msra.mxu1 %v4095_v50  ;;  %v1577_v27 = vpop.f32.mrf.mxu2  ;;  %v4906_v49 = vld [vmem:[#allocation8 + $0x3ec] sm:$0xf0]  ;;  %v1603_v21 = vpop.f32.mrf.mxu1 }
 0x123   :  { %v1578_v31 = vadd.f32 %v1577_v27, %v1564_v19  ;;  %v4443_v54 = vor.u32 %v4906_v49, %v4442_v48  ;;  %v4271_v19 = vor.u32 %v4860_v5, %v4268_v6  ;;  %v4395_v27 = vor.u32 %v4894_v23, %v4394_v12  ;;  %v4036_v48 = vld [vmem:[#allocation8 + $0xb8] sm:$0xf0]  ;;  %v4330_v12 = vld [vmem:[#allocation8 + $0x300] sm:$0xf]  ;;  %v4878_v23 = vld [vmem:[#allocation8 + $0x30c] sm:$0xf0] }
 0x124   :  { %v4239_v49 = vor.u32 %v4852_v45, %v4236_v46 }
 0x125   :  { %v1592_v43 = vadd.f32 %v1591_v37, %v1578_v31  ;;  %2664 = vmatpush.bf16.msra.mxu2 %v4319_v42  ;;  %2622 = vmatpush.bf16.msrb.mxu0 %v4443_v54  ;;  %v4130_v31 = vld [vmem:[#allocation8 + $0x168] sm:$0xf]  ;;  %v5273_v37 = vpop.f32.mrf.mxu0  ;;  %v4848_v54 = vld [vmem:[#allocation8 + $0x224] sm:$0xf] }
 0x126   :  { %2643 = vmatpush.bf16.msra.mxu3 %v3951_v47  ;;  %2657 = vmatpush.bf16.msra.mxu1 %v4079_v59  ;;  %v4284_v59 = vld [vmem:[#allocation8 + $0x2b0] sm:$0xf0]  ;;  %v4131_v42 = vor.u32 %v4827_v32, %v4130_v31  ;;  %v4789_v31 = vld [vmem:[#allocation8 + $0x4c] sm:$0xf]  ;;  %v3988_v32 = vld [vmem:[#allocation8 + $0x58] sm:$0xf0] }
 0x127   :  { %v1795_v50 = vmax.f32 %v1592_v43, 0.0  ;;  %v4287_v3 = vor.u32 %v4864_v40, %v4284_v59  ;;  %v4055_v43 = vor.u32 %v4805_v11, %v4052_v33  ;;  %v4098_v40 = vld [vmem:[#allocation8 + $0x128] sm:$0xf]  ;;  %v4819_v59 = vld [vmem:[#allocation8 + $0x134] sm:$0xf0]  ;;  %v4331_v11 = vor.u32 %v4878_v23, %v4330_v12 }
 0x128   :  { %v4099_v6 = vor.u32 %v4819_v59, %v4098_v40  ;;  %v3991_v45 = vor.u32 %v4789_v31, %v3988_v32  ;;  %v4781_v40 = vld [vmem:[#allocation8 + $0xc] sm:$0xf]  ;;  %v3956_v59 = vld [vmem:[#allocation8 + $0x18] sm:$0xf0]  ;;  %v4888_v32 = vld [vmem:[#allocation8 + $0x364] sm:$0xf] }
 0x129   :  { %2644 = vmatmul.bf16.vlgmr.msra.gmra.mxu3 %v5264_v1  ;;  %v5270_v47 = vpack.c.bf16 %v1795_v50, %v1791_v34  ;;  %2665 = vmatpush.bf16.msra.mxu2 %v4303_v58  ;;  %v4378_v34 = vld [vmem:[#allocation8 + $0x360] sm:$0xf]  ;;  %v4890_v50 = vld [vmem:[#allocation8 + $0x36c] sm:$0xf0]  ;;  %v4039_v58 = vor.u32 %v4801_v44, %v4036_v48  ;;  %v4821_v12 = vld [vmem:[#allocation8 + $0x14c] sm:$0xf] }
 0x12a   :  { %2692 = vmatpush.bf16.msrb.mxu3 %v4067_v62  ;;  %v4427_v62 = vor.u32 %v4902_v61, %v4426_v60  ;;  %v4379_v52 = vor.u32 %v4890_v50, %v4378_v34  ;;  %v1605_v53 = vpop.f32.mrf.mxu1  ;;  %v4886_v60 = vld [vmem:[#allocation8 + $0x34c] sm:$0xf0]  ;;  %v4797_v61 = vld [vmem:[#allocation8 + $0x8c] sm:$0xf]  ;;  %v3972_v34 = vld [vmem:[#allocation8 + $0x38] sm:$0xf0] }
 0x12b   :  { %2602 = vmatmul.bf16.vlgmr.msrb.gmra.mxu1 %v5270_v47  ;;  %v4116_v23 = vld [vmem:[#allocation8 + $0x158] sm:$0xf0] }
 0x12c   :  { %2706 = vmatpush.bf16.msrb.mxu1 %v4195_v55  ;;  %2623 = vmatpush.bf16.msrb.mxu0 %v4427_v62  ;;  %v1617_v41 = vpop.f32.mrf.mxu3  ;;  %v4220_v55 = vld [vmem:[#allocation8 + $0x230] sm:$0xf0]  ;;  %v4020_v62 = vld [vmem:[#allocation8 + $0x98] sm:$0xf0] }
 0x12d   :  { %2666 = vmatpush.bf16.msra.mxu2 %v4287_v3  ;;  %v4204_v3 = vld [vmem:[#allocation8 + $0x210] sm:$0xf0]  ;;  %v1633_v5 = vpop.f32.mrf.mxu0  ;;  %v4100_v31 = vld [vmem:[#allocation8 + $0x138] sm:$0xf0] }
 0x12e   :  { %2693 = vmatpush.bf16.msrb.mxu3 %v4051_v9  ;;  %v3954_v9 = vld [vmem:[#allocation8 + $0x8] sm:$0xf]  ;;  %v4207_v18 = vor.u32 %v4844_v0, %v4204_v3  ;;  %v3959_v0 = vor.u32 %v4781_v40, %v3956_v59  ;;  %v4859_v59 = vld [vmem:[#allocation8 + $0x274] sm:$0xf0] }
 0x12f   :  { %v4258_v40 = vld [vmem:[#allocation8 + $0x268] sm:$0xf] }
 0x130   :  { %2707 = vmatpush.bf16.msrb.mxu1 %v4179_v63  ;;  %v4363_v63 = vor.u32 %v4886_v60, %v4362_v56 }
 0x131   :  { %2667 = vmatpush.bf16.msra.mxu2 %v4271_v19  ;;  %v4347_v19 = vor.u32 %v4882_v17, %v4346_v4  ;;  %v4825_v4 = vld [vmem:[#allocation8 + $0x16c] sm:$0xf] }
 0x132   :  { %2694 = vmatpush.bf16.msrb.mxu3 %v4035_v20  ;;  %v4411_v20 = vor.u32 %v4898_v13, %v4410_v7  ;;  %v4023_v7 = vor.u32 %v4797_v61, %v4020_v62  ;;  %v4829_v62 = vld [vmem:[#allocation8 + $0x18c] sm:$0xf] }
 0x134   :  { %2624 = vmatpush.bf16.msrb.mxu0 %v4411_v20  ;;  %2708 = vmatpush.bf16.msrb.mxu1 %v4163_v14  ;;  %v1619_v13 = vpop.f32.mrf.mxu3  ;;  %v4793_v14 = vld [vmem:[#allocation8 + $0x6c] sm:$0xf] }
 0x135   :  { %2668 = vmatpush.bf16.msra.mxu2 %v4255_v36  ;;  %v1687_v44 = vpop.f32.mrf.mxu0 }
 0x136   :  { %2695 = vmatpush.bf16.msrb.mxu3 %v4019_v26  ;;  %v3955_v26 = vor.u32 %v4783_v10, %v3954_v9  ;;  %v4815_v9 = vld [vmem:[#allocation8 + $0x114] sm:$0xf0] }
 0x138   :  { %2625 = vmatpush.bf16.msrb.mxu0 %v4395_v27  ;;  %2709 = vmatpush.bf16.msrb.mxu1 %v4147_v28  ;;  %v4444_v27 = vld [vmem:[#allocation8 + $0x3f0] sm:$0xf0]  ;;  %v4007_v28 = vor.u32 %v4793_v14, %v4004_v15 }
 0x139   :  { %2669 = vmatpush.bf16.msra.mxu2 %v4239_v49  ;;  %v4447_v39 = vor.u32 %v4904_v25, %v4444_v27  ;;  %v4785_v49 = vld [vmem:[#allocation8 + $0x2c] sm:$0xf]  ;;  %v4396_v14 = vld [vmem:[#allocation8 + $0x390] sm:$0xf0]  ;;  %v4306_v27 = vld [vmem:[#allocation8 + $0x2c8] sm:$0xf] }
 0x13a   :  { %2696 = vmatpush.bf16.msrb.mxu3 %v4003_v51  ;;  %v408_v51 = vperm.slane %v5253_v30, 2  ;;  %v1645_v10 = vpop.f32.mrf.mxu2  ;;  %v3975_v56 = vor.u32 %v4785_v49, %v3972_v34 }
 0x13b   :  { %2658 = vmatmul.bf16.vlgmr.msra.gmra.mxu1 %v5270_v47 }
 0x13c   :  { %2710 = vmatpush.bf16.msrb.mxu1 %v4131_v42  ;;  %2626 = vmatpush.bf16.msrb.mxu0 %v4379_v52  ;;  %v1604_v2 = vadd.f32 %v1603_v21, %v408_v51  ;;  %v1606_v21 = vadd.f32 %v1605_v53, %v408_v51  ;;  %v4900_v42 = vld [vmem:[#allocation8 + $0x3c4] sm:$0xf]  ;;  %v4833_v52 = vld [vmem:[#allocation8 + $0x1ac] sm:$0xf] }
 0x13e   :  { %2697 = vmatpush.bf16.msrb.mxu3 %v3987_v35  ;;  %v4223_v35 = vor.u32 %v4848_v54, %v4220_v55  ;;  %v1618_v20 = vadd.f32 %v1617_v41, %v1604_v2  ;;  %v1620_v36 = vadd.f32 %v1619_v13, %v1606_v21  ;;  %v4837_v41 = vld [vmem:[#allocation8 + $0x1cc] sm:$0xf]  ;;  %v4892_v13 = vld [vmem:[#allocation8 + $0x384] sm:$0xf] }
 0x13f   :  { %v4183_v48 = vor.u32 %v4837_v41, %v4180_v38  ;;  %v4884_v41 = vld [vmem:[#allocation8 + $0x344] sm:$0xf]  ;;  %v4364_v38 = vld [vmem:[#allocation8 + $0x350] sm:$0xf0] }
 0x140   :  { %2711 = vmatpush.bf16.msrb.mxu1 %v4115_v57  ;;  %2670 = vmatpush.bf16.msra.mxu2 %v4223_v35  ;;  %v1632_v33 = vadd.f32 %v5273_v37, %v1618_v20  ;;  %v1634_v51 = vadd.f32 %v1633_v5, %v1620_v36  ;;  %v4164_v37 = vld [vmem:[#allocation8 + $0x1b8] sm:$0xf0]  ;;  %v1689_v5 = vpop.f32.mrf.mxu0  ;;  %v4399_v20 = vor.u32 %v4892_v13, %v4396_v14  ;;  %v4210_v14 = vld [vmem:[#allocation8 + $0x208] sm:$0xf] }
 0x141   :  { %2627 = vmatpush.bf16.msrb.mxu0 %v4363_v63  ;;  %v4148_v35 = vld [vmem:[#allocation8 + $0x198] sm:$0xf0] }
 0x142   :  { %2698 = vmatpush.bf16.msrb.mxu3 %v3971_v8  ;;  %v4082_v8 = vld [vmem:[#allocation8 + $0x108] sm:$0xf]  ;;  %v1659_v24 = vpop.f32.mrf.mxu1  ;;  %v1646_v50 = vadd.f32 %v1645_v10, %v1632_v33  ;;  %v1647_v54 = vpop.f32.mrf.mxu2  ;;  %v4151_v3 = vor.u32 %v4829_v62, %v4148_v35 }
 0x143   :  { %v1648_v60 = vadd.f32 %v1647_v54, %v1634_v51  ;;  %v4863_v51 = vld [vmem:[#allocation8 + $0x294] sm:$0xf0]  ;;  %v4348_v54 = vld [vmem:[#allocation8 + $0x330] sm:$0xf0] }
 0x144   :  { %2712 = vmatpush.bf16.msrb.mxu1 %v4099_v6  ;;  %2671 = vmatpush.bf16.msra.mxu2 %v4207_v18  ;;  %v1660_v55 = vadd.f32 %v1659_v24, %v1646_v50  ;;  %v4875_v18 = vld [vmem:[#allocation8 + $0x2f4] sm:$0xf0]  ;;  %v4274_v50 = vld [vmem:[#allocation8 + $0x288] sm:$0xf] }
 0x145   :  { %2628 = vmatpush.bf16.msrb.mxu0 %v4347_v19 }
 0x146   :  { %2699 = vmatpush.bf16.msrb.mxu3 %v3955_v26  ;;  %v4083_v26 = vor.u32 %v4815_v9, %v4082_v8  ;;  %v4896_v8 = vld [vmem:[#allocation8 + $0x3a4] sm:$0xf]  ;;  %v4412_v9 = vld [vmem:[#allocation8 + $0x3b0] sm:$0xf0] }
 0x147   :  { %v4415_v10 = vor.u32 %v4896_v8, %v4412_v9 }
 0x148   :  { %2713 = vmatpush.bf16.msrb.mxu1 %v4083_v26  ;;  %v4871_v26 = vld [vmem:[#allocation8 + $0x2d4] sm:$0xf0] }
 0x149   :  { %2700 = vmatmul.bf16.vlgmr.msrb.gmra.mxu3 %v5264_v1  ;;  %2629 = vmatpush.bf16.msrb.mxu0 %v4331_v11  ;;  %v4380_v11 = vld [vmem:[#allocation8 + $0x370] sm:$0xf0]  ;;  %v4307_v33 = vor.u32 %v4871_v26, %v4306_v27  ;;  %v4869_v27 = vld [vmem:[#allocation8 + $0x2cc] sm:$0xf]  ;;  %v4308_v26 = vld [vmem:[#allocation8 + $0x2d8] sm:$0xf0] }
 0x14a   :  { %2748 = vmatpush.bf16.msra.mxu3 %v4071_v29  ;;  %v4199_v29 = vor.u32 %v4841_v16, %v4196_v22  ;;  %v1661_v57 = vpop.f32.mrf.mxu1  ;;  %v4322_v16 = vld [vmem:[#allocation8 + $0x2e8] sm:$0xf]  ;;  %v4383_v36 = vor.u32 %v4888_v32, %v4380_v11  ;;  %v4865_v11 = vld [vmem:[#allocation8 + $0x2ac] sm:$0xf] }
 0x14b   :  { %2714 = vmatmul.bf16.vlgmr.msrb.gmra.mxu1 %v5270_v47  ;;  %v1662_v63 = vadd.f32 %v1661_v57, %v1648_v60  ;;  %v4323_v24 = vor.u32 %v4875_v18, %v4322_v16  ;;  %v4876_v57 = vld [vmem:[#allocation8 + $0x304] sm:$0xf]  ;;  %v4873_v18 = vld [vmem:[#allocation8 + $0x2ec] sm:$0xf] }
 0x14c   :  { %2762 = vmatpush.bf16.msra.mxu1 %v4199_v29  ;;  %v1673_v46 = vpop.f32.mrf.mxu3  ;;  %v4817_v29 = vld [vmem:[#allocation8 + $0x12c] sm:$0xf] }
 0x14d   :  { %2678 = vmatpush.bf16.msra.mxu0 %v4447_v39  ;;  %v1674_v61 = vadd.f32 %v1673_v46, %v1660_v55  ;;  %v4290_v39 = vld [vmem:[#allocation8 + $0x2a8] sm:$0xf]  ;;  %v4813_v46 = vld [vmem:[#allocation8 + $0x10c] sm:$0xf]  ;;  %v4275_v55 = vor.u32 %v4863_v51, %v4274_v50 }
 0x14e   :  { %2749 = vmatpush.bf16.msra.mxu3 %v4055_v43  ;;  %v4428_v43 = vld [vmem:[#allocation8 + $0x3d0] sm:$0xf0] }
 0x14f   :  { %v4431_v53 = vor.u32 %v4900_v42, %v4428_v43  ;;  %v1688_v17 = vadd.f32 %v1687_v44, %v1674_v61  ;;  %v4867_v42 = vld [vmem:[#allocation8 + $0x2b4] sm:$0xf0]  ;;  %v4103_v44 = vor.u32 %v4817_v29, %v4100_v31  ;;  %v4311_v31 = vor.u32 %v4869_v27, %v4308_v26  ;;  %v4897_v27 = vld [vmem:[#allocation8 + $0x3ac] sm:$0xf]  ;;  %v4420_v26 = vld [vmem:[#allocation8 + $0x3b8] sm:$0xf0] }
 0x150   :  { %2763 = vmatpush.bf16.msra.mxu1 %v4183_v48  ;;  %v4084_v48 = vld [vmem:[#allocation8 + $0x118] sm:$0xf0]  ;;  %v4291_v34 = vor.u32 %v4867_v42, %v4290_v39 }
 0x151   :  { %2679 = vmatpush.bf16.msra.mxu0 %v4431_v53  ;;  %v1792_v21 = vmax.f32 %v1688_v17, 0.0  ;;  %v4880_v53 = vld [vmem:[#allocation8 + $0x324] sm:$0xf] }
 0x152   :  { %2750 = vmatpush.bf16.msra.mxu3 %v4039_v58  ;;  %v4167_v58 = vor.u32 %v4833_v52, %v4164_v37  ;;  %v4087_v52 = vor.u32 %v4813_v46, %v4084_v48  ;;  %v409_v37 = vperm.slane %v5253_v30, 3  ;;  %v4242_v30 = vld [vmem:[#allocation8 + $0x248] sm:$0xf]  ;;  %v4907_v48 = vld [vmem:[#allocation8 + $0x3f4] sm:$0xf0] }
 0x153   :  { %v4450_v46 = vld [vmem:[#allocation8 + $0x3e8] sm:$0xf] }
 0x154   :  { %2764 = vmatpush.bf16.msra.mxu1 %v4167_v58  ;;  %v1675_v2 = vpop.f32.mrf.mxu3  ;;  %v4332_v58 = vld [vmem:[#allocation8 + $0x310] sm:$0xf0]  ;;  %v4451_v51 = vor.u32 %v4907_v48, %v4450_v46  ;;  %v4915_v46 = vld [vmem:[#allocation11 + $0x38] sm:$0xff] }
 0x155   :  { %v1676_v6 = vadd.f32 %v1675_v2, %v1662_v63  ;;  %2680 = vmatpush.bf16.msra.mxu0 %v4415_v10  ;;  %v4335_v60 = vor.u32 %v4876_v57, %v4332_v58  ;;  %v4259_v63 = vor.u32 %v4859_v59, %v4258_v40  ;;  %v4853_v58 = vld [vmem:[#allocation8 + $0x24c] sm:$0xf]  ;;  %v4244_v40 = vld [vmem:[#allocation8 + $0x258] sm:$0xf0]  ;;  %v4418_v59 = vld [vmem:[#allocation8 + $0x3a8] sm:$0xf] }
 0x156   :  { %2751 = vmatpush.bf16.msra.mxu3 %v4023_v7  ;;  %v4132_v7 = vld [vmem:[#allocation8 + $0x178] sm:$0xf0]  ;;  %v4914_v48 = vld [vmem:[#allocation11 + $0x30] sm:$0xff] }
 0x157   :  { %v1690_v15 = vadd.f32 %v1689_v5, %v1676_v6  ;;  %v4135_v19 = vor.u32 %v4825_v4, %v4132_v7  ;;  %v4226_v5 = vld [vmem:[#allocation8 + $0x228] sm:$0xf]  ;;  %v4851_v6 = vld [vmem:[#allocation8 + $0x234] sm:$0xf0] }
 0x158   :  { %2765 = vmatpush.bf16.msra.mxu1 %v4151_v3  ;;  %v4227_v9 = vor.u32 %v4851_v6, %v4226_v5  ;;  %v4386_v5 = vld [vmem:[#allocation8 + $0x368] sm:$0xf]  ;;  %v4891_v6 = vld [vmem:[#allocation8 + $0x374] sm:$0xf0] }
 0x159   :  { %v1796_v22 = vmax.f32 %v1690_v15, 0.0  ;;  %2681 = vmatpush.bf16.msra.mxu0 %v4399_v20 }
 0x15a   :  { %2752 = vmatpush.bf16.msra.mxu3 %v4007_v28  ;;  %v4119_v28 = vor.u32 %v4821_v12, %v4116_v23  ;;  %v1701_v49 = vpop.f32.mrf.mxu2 }
 0x15b   :  { %v5281_v25 = vpack.c.bf16 %v1796_v22, %v1792_v21  ;;  %v1702_v61 = vadd.f32 %v1701_v49, %v409_v37 }
 0x15c   :  { %2766 = vmatpush.bf16.msra.mxu1 %v4135_v19  ;;  %v4324_v19 = vld [vmem:[#allocation8 + $0x2f8] sm:$0xf0] }
 0x15d   :  { %2616 = vmatmul.bf16.vlgmr.msrb.gmra.mxu2 %v5281_v25  ;;  %2682 = vmatpush.bf16.msra.mxu0 %v4383_v36 }
 0x15e   :  { %2753 = vmatpush.bf16.msra.mxu3 %v3991_v45  ;;  %2720 = vmatpush.bf16.msrb.mxu2 %v4323_v24  ;;  %v4367_v45 = vor.u32 %v4884_v41, %v4364_v38  ;;  %v4327_v24 = vor.u32 %v4873_v18, %v4324_v19  ;;  %v4879_v18 = vld [vmem:[#allocation8 + $0x314] sm:$0xf0]  ;;  %v4905_v19 = vld [vmem:[#allocation8 + $0x3ec] sm:$0xf] }
 0x160   :  { %2767 = vmatpush.bf16.msra.mxu1 %v4119_v28 }
 0x161   :  { %2683 = vmatpush.bf16.msra.mxu0 %v4367_v45 }
 0x162   :  { %2754 = vmatpush.bf16.msra.mxu3 %v3975_v56  ;;  %v1729_v43 = vpop.f32.mrf.mxu1  ;;  %2721 = vmatpush.bf16.msrb.mxu2 %v4307_v33  ;;  %v4351_v56 = vor.u32 %v4880_v53, %v4348_v54  ;;  %v1703_v2 = vpop.f32.mrf.mxu2  ;;  %v4292_v33 = vld [vmem:[#allocation8 + $0x2b8] sm:$0xf0]  ;;  %v4434_v54 = vld [vmem:[#allocation8 + $0x3c8] sm:$0xf] }
 0x163   :  { %v1704_v7 = vadd.f32 %v1703_v2, %v409_v37  ;;  %v4295_v42 = vor.u32 %v4865_v11, %v4292_v33  ;;  %v4260_v37 = vld [vmem:[#allocation8 + $0x278] sm:$0xf0] }
 0x164   :  { %2768 = vmatpush.bf16.msra.mxu1 %v4103_v44  ;;  %v4276_v44 = vld [vmem:[#allocation8 + $0x298] sm:$0xf0] }
 0x165   :  { %2684 = vmatpush.bf16.msra.mxu0 %v4351_v56  ;;  %v4388_v11 = vld [vmem:[#allocation8 + $0x378] sm:$0xf0] }
 0x166   :  { %2755 = vmatpush.bf16.msra.mxu3 %v3959_v0  ;;  %2722 = vmatpush.bf16.msrb.mxu2 %v4291_v34  ;;  %v4855_v0 = vld [vmem:[#allocation8 + $0x254] sm:$0xf0] }
 0x167   :  { %v4243_v17 = vor.u32 %v4855_v0, %v4242_v30  ;;  %v4402_v30 = vld [vmem:[#allocation8 + $0x388] sm:$0xf]  ;;  %v4895_v0 = vld [vmem:[#allocation8 + $0x394] sm:$0xf0] }
 0x168   :  { %2769 = vmatpush.bf16.msra.mxu1 %v4087_v52  ;;  %v4857_v52 = vld [vmem:[#allocation8 + $0x26c] sm:$0xf] }
 0x169   :  { %2756 = vmatmul.bf16.vlgmr.msra.gmra.mxu3 %v5264_v1  ;;  %v1715_v1 = vpop.f32.mrf.mxu0  ;;  %2685 = vmatpush.bf16.msra.mxu0 %v4335_v60  ;;  %v4263_v56 = vor.u32 %v4857_v52, %v4260_v37  ;;  %v4899_v60 = vld [vmem:[#allocation8 + $0x3b4] sm:$0xf0] }
 0x16a   :  { %v1731_v35 = vpop.f32.mrf.mxu1  ;;  %2723 = vmatpush.bf16.msrb.mxu2 %v4275_v55  ;;  %v1716_v4 = vadd.f32 %v1715_v1, %v1702_v61  ;;  %v4903_v55 = vld [vmem:[#allocation8 + $0x3d4] sm:$0xf0]  ;;  %v4247_v61 = vor.u32 %v4853_v58, %v4244_v40  ;;  %3076 = vmatpush.bf16.msrb.mxu3 %v4915_v46  ;;  %v4936_v46 = vld [vmem:[#allocation11 + $0xe0] sm:$0xff] }
 0x16b   :  { %2770 = vmatmul.bf16.vlgmr.msra.gmra.mxu1 %v5270_v47  ;;  %v4847_v47 = vld [vmem:[#allocation8 + $0x214] sm:$0xf0]  ;;  %v4435_v57 = vor.u32 %v4903_v55, %v4434_v54  ;;  %v4909_v54 = vld [vmem:[#allocation11 + $0x8] sm:$0xff] }
 0x16c   :  { %v1743_v3 = vpop.f32.mrf.mxu3  ;;  %v1730_v8 = vadd.f32 %v1729_v43, %v1716_v4  ;;  %v4211_v22 = vor.u32 %v4847_v47, %v4210_v14  ;;  %v4861_v43 = vld [vmem:[#allocation8 + $0x28c] sm:$0xf]  ;;  %v4354_v14 = vld [vmem:[#allocation8 + $0x328] sm:$0xf]  ;;  %v4883_v47 = vld [vmem:[#allocation8 + $0x334] sm:$0xf0] }
 0x16d   :  { %2672 = vmatmul.bf16.vlgmr.msra.gmra.mxu2 %v5281_v25  ;;  %v4279_v50 = vor.u32 %v4861_v43, %v4276_v44  ;;  %v4845_v4 = vld [vmem:[#allocation8 + $0x20c] sm:$0xf]  ;;  %v4340_v44 = vld [vmem:[#allocation8 + $0x318] sm:$0xf0]  ;;  %v4910_v52 = vld [vmem:[#allocation11 + $0x10] sm:$0xff] }
 0x16e   :  { %2724 = vmatpush.bf16.msrb.mxu2 %v4259_v63  ;;  %v1744_v13 = vadd.f32 %v1743_v3, %v1730_v8  ;;  %v4228_v63 = vld [vmem:[#allocation8 + $0x238] sm:$0xf0]  ;;  %v4403_v3 = vor.u32 %v4895_v0, %v4402_v30  ;;  %v4387_v8 = vor.u32 %v4891_v6, %v4386_v5  ;;  %v4877_v43 = vld [vmem:[#allocation8 + $0x30c] sm:$0xf]  ;;  %3077 = vmatpush.bf16.msrb.mxu3 %v4914_v48  ;;  %v4922_v37 = vld [vmem:[#allocation11 + $0x70] sm:$0xff] }
 0x16f   :  { %v4921_v55 = vld [vmem:[#allocation11 + $0x68] sm:$0xff]  ;;  %v4928_v5 = vld [vmem:[#allocation11 + $0xa0] sm:$0xff] }
 0x171   :  { %v1717_v62 = vpop.f32.mrf.mxu0 }
 0x172   :  { %2725 = vmatpush.bf16.msrb.mxu2 %v4243_v17  ;;  %v1785_v16 = vpop.f32.mrf.mxu1  ;;  %v1718_v20 = vadd.f32 %v1717_v62, %v1704_v7  ;;  %v4419_v62 = vor.u32 %v4899_v60, %v4418_v59  ;;  %v4212_v17 = vld [vmem:[#allocation8 + $0x218] sm:$0xf0] }
 0x173   :  { %v4215_v7 = vor.u32 %v4845_v4, %v4212_v17  ;;  %v4919_v59 = vld [vmem:[#allocation11 + $0x58] sm:$0xff]  ;;  %v4916_v17 = vld [vmem:[#allocation11 + $0x40] sm:$0xff] }
 0x174   :  { %v1745_v21 = vpop.f32.mrf.mxu3  ;;  %v1732_v12 = vadd.f32 %v1731_v35, %v1718_v20  ;;  %v4849_v35 = vld [vmem:[#allocation8 + $0x22c] sm:$0xf]  ;;  %v4452_v20 = vld [vmem:[#allocation8 + $0x3f8] sm:$0xf0] }
 0x175   :  { %v4231_v2 = vor.u32 %v4849_v35, %v4228_v63  ;;  %v4931_v60 = vld [vmem:[#allocation11 + $0xb8] sm:$0xff] }
 0x176   :  { %2726 = vmatpush.bf16.msrb.mxu2 %v4227_v9  ;;  %v1746_v28 = vadd.f32 %v1745_v21, %v1732_v12  ;;  %v4370_v9 = vld [vmem:[#allocation8 + $0x348] sm:$0xf]  ;;  %v4901_v12 = vld [vmem:[#allocation8 + $0x3cc] sm:$0xf]  ;;  %v5295_v35 = vld [vmem:[#allocation10] sm:$0xf] }
 0x177   :  { %v1932_v4 = vperm.slane %v5295_v35, 0 }
 0x179   :  { %v1771_v10 = vpop.f32.mrf.mxu0 }
 0x17a   :  { %v1757_v15 = vpop.f32.mrf.mxu2  ;;  %2727 = vmatpush.bf16.msrb.mxu2 %v4211_v22  ;;  %v1787_v38 = vpop.f32.mrf.mxu1  ;;  %v4455_v22 = vor.u32 %v4905_v19, %v4452_v20 }
 0x17b   :  { %v1758_v23 = vadd.f32 %v1757_v15, %v1744_v13  ;;  %v4355_v15 = vor.u32 %v4883_v47, %v4354_v14 }
 0x17d   :  { %v1772_v29 = vadd.f32 %v1771_v10, %v1758_v23  ;;  %2728 = vmatmul.bf16.vlgmr.msrb.gmra.mxu2 %v5281_v25  ;;  %v4887_v10 = vld [vmem:[#allocation8 + $0x354] sm:$0xf0]  ;;  %v4436_v23 = vld [vmem:[#allocation8 + $0x3d8] sm:$0xf0] }
 0x17e   :  { %2776 = vmatpush.bf16.msra.mxu2 %v4327_v24  ;;  %v4371_v13 = vor.u32 %v4887_v10, %v4370_v9  ;;  %v4439_v24 = vor.u32 %v4901_v12, %v4436_v23  ;;  %v4927_v10 = vld [vmem:[#allocation11 + $0x98] sm:$0xff] }
 0x17f   :  { %v1786_v1 = vadd.f32 %v1785_v16, %v1772_v29  ;;  %v4338_v16 = vld [vmem:[#allocation8 + $0x308] sm:$0xf]  ;;  %v4404_v29 = vld [vmem:[#allocation8 + $0x398] sm:$0xf0] }
 0x180   :  { %v4339_v21 = vor.u32 %v4879_v18, %v4338_v16  ;;  %v4926_v18 = vld [vmem:[#allocation11 + $0x90] sm:$0xff] }
 0x181   :  { %v1773_v41 = vpop.f32.mrf.mxu0  ;;  %v1793_v49 = vmax.f32 %v1786_v1, 0.0  ;;  %v4881_v1 = vld [vmem:[#allocation8 + $0x32c] sm:$0xf] }
 0x182   :  { %v1759_v32 = vpop.f32.mrf.mxu2  ;;  %2777 = vmatpush.bf16.msra.mxu2 %v4311_v31 }
 0x183   :  { %v1760_v36 = vadd.f32 %v1759_v32, %v1746_v28  ;;  %v4893_v28 = vld [vmem:[#allocation8 + $0x38c] sm:$0xf] }
 0x184   :  { %v4407_v31 = vor.u32 %v4893_v28, %v4404_v29  ;;  %v4889_v32 = vld [vmem:[#allocation8 + $0x36c] sm:$0xf] }
 0x185   :  { %v1774_v39 = vadd.f32 %v1773_v41, %v1760_v36  ;;  %v4391_v33 = vor.u32 %v4889_v32, %v4388_v11  ;;  %v4885_v36 = vld [vmem:[#allocation8 + $0x34c] sm:$0xf]  ;;  %v4372_v41 = vld [vmem:[#allocation8 + $0x358] sm:$0xf0]  ;;  %v4938_v32 = vld [vmem:[#allocation11 + $0xf0] sm:$0xff] }
 0x186   :  { %2778 = vmatpush.bf16.msra.mxu2 %v4295_v42 }
 0x187   :  { %v1788_v45 = vadd.f32 %v1787_v38, %v1774_v39  ;;  %v4375_v38 = vor.u32 %v4885_v36, %v4372_v41  ;;  %v4356_v39 = vld [vmem:[#allocation8 + $0x338] sm:$0xf0] }
 0x188   :  { %v4359_v42 = vor.u32 %v4881_v1, %v4356_v39  ;;  %v4937_v1 = vld [vmem:[#allocation11 + $0xe8] sm:$0xff] }
 0x189   :  { %v1797_v34 = vmax.f32 %v1788_v45, 0.0  ;;  %v4343_v45 = vor.u32 %v4877_v43, %v4340_v44 }
 0x18a   :  { %2779 = vmatpush.bf16.msra.mxu2 %v4279_v50  ;;  %v4911_v50 = vld [vmem:[#allocation11 + $0x18] sm:$0xff] }
 0x18b   :  { %v5288_v53 = vpack.c.bf16 %v1797_v34, %v1793_v49  ;;  %v4913_v49 = vld [vmem:[#allocation11 + $0x28] sm:$0xff]  ;;  %v4912_v34 = vld [vmem:[#allocation11 + $0x20] sm:$0xff] }
 0x18c   :  { %3078 = vmatpush.bf16.msrb.mxu3 %v4913_v49  ;;  %v2589_v58 = vpop.f32.mrf.mxu3 }
 0x18d   :  { %2630 = vmatmul.bf16.vlgmr.msrb.gmra.mxu0 %v5288_v53 }
 0x18e   :  { %2734 = vmatpush.bf16.msrb.mxu0 %v4451_v51  ;;  %2780 = vmatpush.bf16.msra.mxu2 %v4263_v56  ;;  %v4923_v51 = vld [vmem:[#allocation11 + $0x78] sm:$0xff]  ;;  %v4920_v56 = vld [vmem:[#allocation11 + $0x60] sm:$0xff] }
 0x18f   :  { %3090 = vmatpush.bf16.msrb.mxu1 %v4923_v51 }
 0x190   :  { %3079 = vmatpush.bf16.msrb.mxu3 %v4912_v34 }
 0x192   :  { %2735 = vmatpush.bf16.msrb.mxu0 %v4435_v57  ;;  %2781 = vmatpush.bf16.msra.mxu2 %v4247_v61  ;;  %v4930_v61 = vld [vmem:[#allocation11 + $0xb0] sm:$0xff] }
 0x193   :  { %3091 = vmatpush.bf16.msrb.mxu1 %v4922_v37  ;;  %v1934_v37 = vperm.slane %v5295_v35, 2 }
 0x194   :  { %3080 = vmatpush.bf16.msrb.mxu3 %v4911_v50  ;;  %v2591_v30 = vpop.f32.mrf.mxu3 }
 0x196   :  { %2736 = vmatpush.bf16.msrb.mxu0 %v4419_v62  ;;  %2782 = vmatpush.bf16.msra.mxu2 %v4231_v2  ;;  %v4918_v62 = vld [vmem:[#allocation11 + $0x50] sm:$0xff]  ;;  %v4917_v2 = vld [vmem:[#allocation11 + $0x48] sm:$0xff] }
 0x197   :  { %3092 = vmatpush.bf16.msrb.mxu1 %v4921_v55 }
 0x198   :  { %3081 = vmatpush.bf16.msrb.mxu3 %v4910_v52 }
 0x19a   :  { %2737 = vmatpush.bf16.msrb.mxu0 %v4403_v3  ;;  %2783 = vmatpush.bf16.msra.mxu2 %v4215_v7  ;;  %v4929_v3 = vld [vmem:[#allocation11 + $0xa8] sm:$0xff]  ;;  %v2590_v7 = vadd.f32 %v2589_v58, %v1932_v4 }
 0x19b   :  { %3093 = vmatpush.bf16.msrb.mxu1 %v4920_v56  ;;  %v4935_v56 = vld [vmem:[#allocation11 + $0xd8] sm:$0xff] }
 0x19c   :  { %3082 = vmatpush.bf16.msrb.mxu3 %v4909_v54 }
 0x19d   :  { %2686 = vmatmul.bf16.vlgmr.msra.gmra.mxu0 %v5288_v53  ;;  %2784 = vmatmul.bf16.vlgmr.msra.gmra.mxu2 %v5281_v25  ;;  %v4423_v25 = vor.u32 %v4897_v27, %v4420_v26  ;;  %v1933_v27 = vperm.slane %v5295_v35, 1 }
 0x19e   :  { %2738 = vmatpush.bf16.msrb.mxu0 %v4387_v8  ;;  %3104 = vmatpush.bf16.msrb.mxu2 %v4931_v60  ;;  %v2592_v8 = vadd.f32 %v2591_v30, %v1932_v4 }
 0x19f   :  { %3094 = vmatpush.bf16.msrb.mxu1 %v4919_v59 }
 0x1a2   :  { %2739 = vmatpush.bf16.msrb.mxu0 %v4371_v13  ;;  %3105 = vmatpush.bf16.msrb.mxu2 %v4930_v61 }
 0x1a3   :  { %3095 = vmatpush.bf16.msrb.mxu1 %v4918_v62 }
 0x1a6   :  { %2740 = vmatpush.bf16.msrb.mxu0 %v4355_v15  ;;  %3106 = vmatpush.bf16.msrb.mxu2 %v4929_v3  ;;  %v4933_v3 = vld [vmem:[#allocation11 + $0xc8] sm:$0xff] }
 0x1a7   :  { %3096 = vmatpush.bf16.msrb.mxu1 %v4917_v2 }
 0x1a8   :  { %v2603_v57 = vpop.f32.mrf.mxu1 }
 0x1a9   :  { %v2604_v9 = vadd.f32 %v2603_v57, %v2590_v7 }
 0x1aa   :  { %2741 = vmatpush.bf16.msrb.mxu0 %v4339_v21  ;;  %3107 = vmatpush.bf16.msrb.mxu2 %v4928_v5 }
 0x1ab   :  { %3097 = vmatpush.bf16.msrb.mxu1 %v4916_v17  ;;  %v4932_v17 = vld [vmem:[#allocation11 + $0xc0] sm:$0xff] }
 0x1ac   :  { %v2645_v13 = vpop.f32.mrf.mxu3 }
 0x1ad   :  { %2742 = vmatmul.bf16.vlgmr.msrb.gmra.mxu0 %v5288_v53  ;;  %v2646_v36 = vadd.f32 %v2645_v13, %v1933_v27  ;;  %v1935_v13 = vperm.slane %v5295_v35, 3  ;;  %v4955_v35 = vld [vmem:[%s5313_s6] ss:$0 sm:$0xff] }
 0x1ae   :  { %2790 = vmatpush.bf16.msra.mxu0 %v4455_v22  ;;  %3108 = vmatpush.bf16.msrb.mxu2 %v4927_v10 }
 0x1b0   :  { %v2605_v63 = vpop.f32.mrf.mxu1 }
 0x1b1   :  { %v2606_v47 = vadd.f32 %v2605_v63, %v2592_v8 }
 0x1b2   :  { %2791 = vmatpush.bf16.msra.mxu0 %v4439_v24  ;;  %3109 = vmatpush.bf16.msrb.mxu2 %v4926_v18  ;;  %v4925_v24 = vld [vmem:[#allocation11 + $0x88] sm:$0xff] }
 0x1b4   :  { %v2647_v28 = vpop.f32.mrf.mxu3 }
 0x1b5   :  { %v2648_v41 = vadd.f32 %v2647_v28, %v1933_v27 }
 0x1b6   :  { %2792 = vmatpush.bf16.msra.mxu0 %v4423_v25  ;;  %v4939_v25 = vld [vmem:[#allocation11 + $0xf8] sm:$0xff]  ;;  %3110 = vmatpush.bf16.msrb.mxu2 %v4925_v24 }
 0x1b8   :  { %v2659_v14 = vpop.f32.mrf.mxu1 }
 0x1ba   :  { %2793 = vmatpush.bf16.msra.mxu0 %v4407_v31  ;;  %v4924_v31 = vld [vmem:[#allocation11 + $0x80] sm:$0xff] }
 0x1bb   :  { %3111 = vmatpush.bf16.msrb.mxu2 %v4924_v31 }
 0x1be   :  { %2794 = vmatpush.bf16.msra.mxu0 %v4391_v33 }
 0x1c0   :  { %v2661_v29 = vpop.f32.mrf.mxu1 }
 0x1c1   :  { %v2662_v39 = vadd.f32 %v2661_v29, %v2648_v41 }
 0x1c2   :  { %2795 = vmatpush.bf16.msra.mxu0 %v4375_v38  ;;  %v2660_v38 = vadd.f32 %v2659_v14, %v2646_v36 }
 0x1c6   :  { %2796 = vmatpush.bf16.msra.mxu0 %v4359_v42 }
 0x1c8   :  { %v2715_v48 = vpop.f32.mrf.mxu1 }
 0x1ca   :  { %2797 = vmatpush.bf16.msra.mxu0 %v4343_v45 }
 0x1cc   :  { %v2701_v43 = vpop.f32.mrf.mxu3 }
 0x1cd   :  { %2798 = vmatmul.bf16.vlgmr.msra.gmra.mxu0 %v5288_v53  ;;  %v4908_v53 = vld [vmem:[#allocation11] sm:$0xff]  ;;  %v2702_v57 = vadd.f32 %v2701_v43, %v1934_v37 }
 0x1ce   :  { %3083 = vmatpush.bf16.msrb.mxu3 %v4908_v53  ;;  %3118 = vmatpush.bf16.msrb.mxu0 %v4939_v25 }
 0x1cf   :  { %v2716_v60 = vadd.f32 %v2715_v48, %v2702_v57 }
 0x1d0   :  { %v2717_v58 = vpop.f32.mrf.mxu1 }
 0x1d2   :  { %3119 = vmatpush.bf16.msrb.mxu0 %v4938_v32 }
 0x1d4   :  { %v2703_v55 = vpop.f32.mrf.mxu3 }
 0x1d5   :  { %v2704_v59 = vadd.f32 %v2703_v55, %v1934_v37 }
 0x1d6   :  { %3120 = vmatpush.bf16.msrb.mxu0 %v4937_v1 }
 0x1d7   :  { %v2718_v62 = vadd.f32 %v2717_v58, %v2704_v59 }
 0x1da   :  { %3121 = vmatpush.bf16.msrb.mxu0 %v4936_v46 }
 0x1de   :  { %3122 = vmatpush.bf16.msrb.mxu0 %v4935_v56 }
 0x1e0   :  { %v2617_v40 = vpop.f32.mrf.mxu2 }
 0x1e1   :  { %v2618_v15 = vadd.f32 %v2617_v40, %v2604_v9  ;;  %v4934_v40 = vld [vmem:[#allocation11 + $0xd0] sm:$0xff] }
 0x1e2   :  { %3123 = vmatpush.bf16.msrb.mxu0 %v4934_v40 }
 0x1e6   :  { %3124 = vmatpush.bf16.msrb.mxu0 %v4933_v3 }
 0x1e8   :  { %v2619_v0 = vpop.f32.mrf.mxu2  ;;  %v2771_v9 = vpop.f32.mrf.mxu1 }
 0x1e9   :  { %v2620_v19 = vadd.f32 %v2619_v0, %v2606_v47 }
 0x1ea   :  { %3125 = vmatpush.bf16.msrb.mxu0 %v4932_v17 }
 0x1ec   :  { %v2757_v8 = vpop.f32.mrf.mxu3 }
 0x1f0   :  { %v2673_v16 = vpop.f32.mrf.mxu2 }
 0x1f1   :  { %v2674_v42 = vadd.f32 %v2673_v16, %v2660_v38  ;;  %v2773_v16 = vpop.f32.mrf.mxu1 }
 0x1f4   :  { %v2759_v14 = vpop.f32.mrf.mxu3 }
 0x1f5   :  { %v2760_v18 = vadd.f32 %v2759_v14, %v1935_v13 }
 0x1f8   :  { %v2675_v11 = vpop.f32.mrf.mxu2 }
 0x1f9   :  { %v2676_v44 = vadd.f32 %v2675_v11, %v2662_v39 }
 0x200   :  { %v2729_v50 = vpop.f32.mrf.mxu2 }
 0x201   :  { %v2730_v63 = vadd.f32 %v2729_v50, %v2716_v60 }
 0x208   :  { %v2731_v61 = vpop.f32.mrf.mxu2 }
 0x209   :  { %v2732_v30 = vadd.f32 %v2731_v61, %v2718_v62 }
 0x20a   :  { %v2631_v6 = vpop.f32.mrf.mxu0 }
 0x20b   :  { %v2632_v20 = vadd.f32 %v2631_v6, %v2618_v15  ;;  %v2758_v15 = vadd.f32 %v2757_v8, %v1935_v13 }
 0x20d   :  { %v2804_v12 = vmax.f32 %v2632_v20, 0.0 }
 0x212   :  { %v2633_v21 = vpop.f32.mrf.mxu0 }
 0x213   :  { %v2634_v22 = vadd.f32 %v2633_v21, %v2620_v19  ;;  %v2772_v19 = vadd.f32 %v2771_v9, %v2758_v15  ;;  %v2774_v21 = vadd.f32 %v2773_v16, %v2760_v18 }
 0x215   :  { %v2808_v23 = vmax.f32 %v2634_v22, 0.0 }
 0x217   :  { %v2812_v26 = vpack.c.bf16 %v2808_v23, %v2804_v12 }
 0x219   :  { %3084 = vmatmul.bf16.vlgmr.msrb.gmra.mxu3 %v2812_v26 }
 0x21a   :  { %v2687_v33 = vpop.f32.mrf.mxu0 }
 0x21b   :  { %v2688_v45 = vadd.f32 %v2687_v33, %v2674_v42 }
 0x21d   :  { %v2805_v51 = vmax.f32 %v2688_v45, 0.0 }
 0x220   :  { %v2785_v10 = vpop.f32.mrf.mxu2 }
 0x221   :  { %v2786_v22 = vadd.f32 %v2785_v10, %v2772_v19 }
 0x222   :  { %v2689_v49 = vpop.f32.mrf.mxu0 }
 0x223   :  { %v2690_v34 = vadd.f32 %v2689_v49, %v2676_v44 }
 0x225   :  { %v2809_v52 = vmax.f32 %v2690_v34, 0.0 }
 0x227   :  { %v2813_v54 = vpack.c.bf16 %v2809_v52, %v2805_v51 }
 0x228   :  { %v2787_v20 = vpop.f32.mrf.mxu2 }
 0x229   :  { %3098 = vmatmul.bf16.vlgmr.msrb.gmra.mxu1 %v2813_v54  ;;  %v2788_v12 = vadd.f32 %v2787_v20, %v2774_v21 }
 0x22a   :  { %v2743_v53 = vpop.f32.mrf.mxu0 }
 0x22b   :  { %v2744_v0 = vadd.f32 %v2743_v53, %v2730_v63 }
 0x22d   :  { %v2806_v5 = vmax.f32 %v2744_v0, 0.0 }
 0x232   :  { %v2745_v2 = vpop.f32.mrf.mxu0 }
 0x233   :  { %v2746_v4 = vadd.f32 %v2745_v2, %v2732_v30 }
 0x235   :  { %v2810_v6 = vmax.f32 %v2746_v4, 0.0 }
 0x237   :  { %v2814_v7 = vpack.c.bf16 %v2810_v6, %v2806_v5 }
 0x239   :  { %3112 = vmatmul.bf16.vlgmr.msrb.gmra.mxu2 %v2814_v7 }
 0x24a   :  { %v2799_v47 = vpop.f32.mrf.mxu0 }
 0x24b   :  { %v2800_v23 = vadd.f32 %v2799_v47, %v2786_v22 }
 0x24d   :  { %v2807_v26 = vmax.f32 %v2800_v23, 0.0 }
 0x252   :  { %v2801_v24 = vpop.f32.mrf.mxu0 }
 0x253   :  { %v2802_v27 = vadd.f32 %v2801_v24, %v2788_v12 }
 0x255   :  { %v2811_v25 = vmax.f32 %v2802_v27, 0.0 }
 0x257   :  { %v2815_v28 = vpack.c.bf16 %v2811_v25, %v2807_v26 }
 0x259   :  { %3126 = vmatmul.bf16.vlgmr.msrb.gmra.mxu0 %v2815_v28 }
 0x29c   :  { %v3085_v29 = vpop.f32.mrf.mxu3 }
 0x29d   :  { %v3086_v11 = vadd.f32 %v4955_v35, %v3085_v29 }
 0x2a4   :  { %v3087_v41 = vpop.f32.mrf.mxu3 }
 0x2a5   :  { %v3088_v42 = vadd.f32 %v4955_v35, %v3087_v41 }
 0x2a6   :  { %v3099_v31 = vpop.f32.mrf.mxu1 }
 0x2a7   :  { %v3100_v33 = vadd.f32 %v3099_v31, %v3086_v11 }
 0x2ae   :  { %v3101_v39 = vpop.f32.mrf.mxu1 }
 0x2af   :  { %v3102_v44 = vadd.f32 %v3101_v39, %v3088_v42 }
 0x2bc   :  { %v3113_v32 = vpop.f32.mrf.mxu2 }
 0x2bd   :  { %v3114_v36 = vadd.f32 %v3113_v32, %v3100_v33 }
 0x2c4   :  { %v3115_v43 = vpop.f32.mrf.mxu2 }
 0x2c5   :  { %v3116_v45 = vadd.f32 %v3115_v43, %v3102_v44 }
 0x2d6   :  { %v3127_v38 = vpop.f32.mrf.mxu0 }
 0x2d7   :  { %v3128_v1 = vadd.f32 %v3127_v38, %v3114_v36 }
 0x2d9   :  { %3132 = vst [vmem:[#allocation13] sm:$0xff] %v3128_v1 }
 0x2de   :  { %v3129_v46 = vpop.f32.mrf.mxu0 }
 0x2df   :  { %v3130_v48 = vadd.f32 %v3129_v46, %v3116_v45 }
 0x2e1   :  { %3133 = vst [vmem:[#allocation13 + $0x8] sm:$0xff] %v3130_v48 }
 0x2e2   :  { %3137 = vsyncadd [#allocation4], 224  ;;  %s3140_s11 = sshll.u32 %s5314_s7, 4  ;;  %s5146_s12 = smov [#allocation13]   ;;  %s3141_s11 = int_to_ptr.hbm [resolvable:$true] %s3140_s11 }
 0x2e3   :  { %s3138_s13 = sshll.u32 %s5146_s12, 4  ;;  %s5147_s14 = smov 32   ;;  %s3139_s13 = int_to_ptr.vmem [resolvable:$true] %s3138_s13 }
 0x2e4   :  { %s5148_s15 = smov 2  }
 0x2e5   :  { %3146 = dma.vmem_to_hbm [thread:$0]  %s3139_s13, 32, %s3141_s11, [#allocation4], %s5147_s14, %s5147_s14, %s5148_s15  }
 0x2e6   :  { %5132 = dma.done.wait [#allocation4], 256  }
 0x2e7   :  { %5133 = vsyncadd [#allocation4], 4294967040 }
 0x2e8   :  { %3151 = vsyncpa [#allocation3], 1 }
 0x2e9   :  { %3152 = vsyncpa [#allocation6], 1 }
 0x2ea   :  { %3153 = vsyncpa [#allocation9], 1 }
 0x2eb   :  { %3154 = vsyncpa [#allocation12], 1 }
 0x2ec   :  { %3155 = vsyncpa [#allocation4], 1 }

</bundles_post_ra>
